<compile_context>
chip_gen: v5e
topology: v5e:2x2
jax: 0.10.0
libtpu: 0.0.40
codegen_flags: <defaults>
</compile_context>

<pallas_src>
import functools

import jax
import jax.numpy as jnp
from jax import lax
from jax.experimental import pallas as pl
from jax.experimental.pallas import tpu as pltpu

LOG_STD_MAX = 2.0
LOG_STD_MIN = -5.0
# log_std = LOG_STD_MIN + 0.5*(MAX-MIN)*(tanh(z)+1)  ==  A*tanh(z) + C
_LOG_STD_A = 0.5 * (LOG_STD_MAX - LOG_STD_MIN)                  # 3.5
_LOG_STD_C = LOG_STD_MIN + 0.5 * (LOG_STD_MAX - LOG_STD_MIN)    # -1.5


def _round_up(x, m):
    return ((x + m - 1) // m) * m


# ----------------------------------------------------------------------------- kernel
def actor_forward_kernel(x_ref,
                         w1_ref, b1_ref,
                         w2_ref, b2_ref,
                         w3_ref, b3_ref,
                         wh_ref, bh_ref,
                         out_ref, *, head_pad):
    # x is bf16 (TILE_B, obs_dim); weights are bf16; biases f32.
    x = x_ref[...]

    # backbone: 3 x (Linear + ReLU). MXU runs bf16 operands with f32 accumulation;
    # bias add / ReLU stay in f32, activations re-cast to bf16 for the next dot.
    h = jnp.dot(x, w1_ref[...], preferred_element_type=jnp.float32) + b1_ref[...]
    h = jnp.maximum(h, 0.0).astype(jnp.bfloat16)
    h = jnp.dot(h, w2_ref[...], preferred_element_type=jnp.float32) + b2_ref[...]
    h = jnp.maximum(h, 0.0).astype(jnp.bfloat16)
    h = jnp.dot(h, w3_ref[...], preferred_element_type=jnp.float32) + b3_ref[...]
    h = jnp.maximum(h, 0.0).astype(jnp.bfloat16)

    # fused heads: one lane-dense matmul producing (TILE_B, 2*head_pad).
    # lanes [0, head_pad)            -> mean columns (zero-padded past act_dim)
    # lanes [head_pad, 2*head_pad)   -> log_std columns (zero-padded past act_dim)
    z = jnp.dot(h, wh_ref[...], preferred_element_type=jnp.float32) + bh_ref[...]

    # tanh rides the EUP slot; the affine is a single fused scale+bias on the VPU.
    log_std = _LOG_STD_A * jnp.tanh(z) + _LOG_STD_C
    col = lax.broadcasted_iota(jnp.int32, z.shape, 1)
    out_ref[...] = jnp.where(col >= head_pad, log_std, z).astype(out_ref.dtype)


# ------------------------------------------------------------------------ preparation
def prepare_actor_params(params):
    """One-time packing: fused lane-dense head, bf16 weight casts, bias reshapes.

    Call once outside the hot path and reuse the result across forward calls
    (the review showed per-call re-packing dominating wall time at B=2).
    """
    obs_dim, hidden = params["w1"].shape
    act_dim = params["wm"].shape[1]

    # each head padded to a lane-aligned width; 2*head_pad is a multiple of 128.
    head_pad = max(64, _round_up(act_dim, 64))
    out_w = 2 * head_pad

    wh = jnp.zeros((hidden, out_w), jnp.float32)
    wh = wh.at[:, :act_dim].set(params["wm"])
    wh = wh.at[:, head_pad:head_pad + act_dim].set(params["ws"])
    bh = jnp.zeros((1, out_w), jnp.float32)
    bh = bh.at[:, :act_dim].set(params["bm"].reshape(1, -1))
    bh = bh.at[:, head_pad:head_pad + act_dim].set(params["bs"].reshape(1, -1))

    prepared = dict(
        w1=params["w1"].astype(jnp.bfloat16),
        b1=params["b1"].reshape(1, hidden).astype(jnp.float32),
        w2=params["w2"].astype(jnp.bfloat16),
        b2=params["b2"].reshape(1, hidden).astype(jnp.float32),
        w3=params["w3"].astype(jnp.bfloat16),
        b3=params["b3"].reshape(1, hidden).astype(jnp.float32),
        wh=wh.astype(jnp.bfloat16),
        bh=bh,
        # static metadata (Python ints) used for BlockSpec construction
        obs_dim=int(obs_dim), hidden=int(hidden),
        act_dim=int(act_dim), head_pad=int(head_pad),
    )
    # force materialization now so the packing cost is paid here, not at first forward
    prepared = {k: (jax.block_until_ready(v) if hasattr(v, "block_until_ready") else v)
                for k, v in prepared.items()}
    return prepared


def _select_tile_b(B):
    """Adaptive batch tile: big enough to amortize per-step overhead, >=2 grid
    steps where possible (v7x megacore + pipeline overlap), capped per-generation."""
    max_tile = 1024
    try:
        kind = jax.devices()[0].device_kind.lower()
        if "v5 lite" in kind or "v5lite" in kind or "v5e" in kind:
            max_tile = 512          # slower MXU already amortizes grid-step overhead
    except Exception:
        pass
    B_pad128 = _round_up(max(B, 1), 128)
    if B_pad128 <= 128:
        return 128                  # tiny batch: single 128-row step, no extra padding
    return int(min(max_tile, _round_up(pl.cdiv(B_pad128, 2), 128)))


# ---------------------------------------------------------------------------- forward
def actor_forward(x, prepared, *, tile_b=None, out_dtype=jnp.float32):
    """x: (B, obs_dim) f32. prepared: output of prepare_actor_params().

    Returns (mean, log_std), each (B, act_dim) f32.
    """
    B, obs_dim = x.shape
    hidden = prepared["hidden"]
    act_dim = prepared["act_dim"]
    head_pad = prepared["head_pad"]
    out_w = 2 * head_pad
    assert obs_dim == prepared["obs_dim"]

    if tile_b is None:
        tile_b = _select_tile_b(B)

    # ---- cast BEFORE padding: avoids materializing a full-size padded f32 copy
    B_pad = _round_up(max(B, 1), tile_b)
    x_bf = x.astype(jnp.bfloat16)
    if B_pad != B:
        x_bf = jnp.pad(x_bf, ((0, B_pad - B), (0, 0)))

    grid = (B_pad // tile_b,)

    # x / output are tiled over the batch; every weight / bias maps to block (0,0)
    # and is single-buffered (loaded once, stays resident in VMEM across the grid).
    resident = lambda shape: pl.BlockSpec(shape, lambda i: (0, 0),
                                          pipeline_mode=pl.Buffered(1))
    in_specs = [
        pl.BlockSpec((tile_b, obs_dim), lambda i: (i, 0)),   # x tile (pipelined)
        resident((obs_dim, hidden)), resident((1, hidden)),  # w1, b1
        resident((hidden, hidden)), resident((1, hidden)),   # w2, b2
        resident((hidden, hidden)), resident((1, hidden)),   # w3, b3
        resident((hidden, out_w)), resident((1, out_w)),     # fused head w, b
    ]
    out_spec = pl.BlockSpec((tile_b, out_w), lambda i: (i, 0))

    weight_bytes = 2 * (obs_dim * hidden + 2 * hidden * hidden + hidden * out_w)
    bias_bytes = 4 * (3 * hidden + out_w)
    cost = pl.CostEstimate(
        flops=2 * B_pad * (obs_dim * hidden + 2 * hidden * hidden + hidden * out_w),
        transcendentals=B_pad * out_w,
        bytes_accessed=(2 * B_pad * obs_dim + weight_bytes + bias_bytes
                        + B_pad * out_w * jnp.dtype(out_dtype).itemsize),
    )

    kernel = functools.partial(actor_forward_kernel, head_pad=head_pad)

    out = pl.pallas_call(
        kernel,
        out_shape=jax.ShapeDtypeStruct((B_pad, out_w), out_dtype),
        grid=grid,
        in_specs=in_specs,
        out_specs=out_spec,
        compiler_params=pltpu.CompilerParams(
            dimension_semantics=("parallel",),   # batch axis: megacore-shardable on v7x
        ),
        cost_estimate=cost,
    )(x_bf,
      prepared["w1"], prepared["b1"],
      prepared["w2"], prepared["b2"],
      prepared["w3"], prepared["b3"],
      prepared["wh"], prepared["bh"])

    mean = out[:B, :act_dim].astype(jnp.float32)
    log_std = out[:B, head_pad:head_pad + act_dim].astype(jnp.float32)
    return mean, log_std


# --------------------------------------------------------------------------- test util
def init_actor_params(key, obs_dim, act_dim, hidden=256):
    """Deterministic synthetic init (PyTorch-Linear-style uniform(-1/sqrt(fan_in), ..))."""
    def linear(k, fan_in, fan_out):
        kw, kb = jax.random.split(k)
        bound = 1.0 / jnp.sqrt(fan_in)
        w = jax.random.uniform(kw, (fan_in, fan_out), jnp.float32, -bound, bound)
        b = jax.random.uniform(kb, (1, fan_out), jnp.float32, -bound, bound)
        return w, b

    k1, k2, k3, km, ks = jax.random.split(key, 5)
    w1, b1 = linear(k1, obs_dim, hidden)
    w2, b2 = linear(k2, hidden, hidden)
    w3, b3 = linear(k3, hidden, hidden)
    wm, bm = linear(km, hidden, act_dim)
    ws, bs = linear(ks, hidden, act_dim)
    return dict(w1=w1, b1=b1, w2=w2, b2=b2, w3=w3, b3=b3,
                wm=wm, bm=bm, ws=ws, bs=bs)


def actor_forward_ref(x, p):
    """Pure-JAX f32 reference matching the PyTorch module."""
    h = jnp.maximum(x @ p["w1"] + p["b1"], 0.0)
    h = jnp.maximum(h @ p["w2"] + p["b2"], 0.0)
    h = jnp.maximum(h @ p["w3"] + p["b3"], 0.0)
    mean = h @ p["wm"] + p["bm"]
    log_std = jnp.tanh(h @ p["ws"] + p["bs"])
    log_std = LOG_STD_MIN + 0.5 * (LOG_STD_MAX - LOG_STD_MIN) * (log_std + 1.0)
    return mean, log_std


if __name__ == "__main__":
    key = jax.random.PRNGKey(0)
    k_params, k_x1, k_x2 = jax.random.split(key, 3)

    OBS_DIM, ACT_DIM = 32, 8   # small shapes consistent with the module
    params = init_actor_params(k_params, OBS_DIM, ACT_DIM)
    prepared = prepare_actor_params(params)   # one-time packing (hoisted out of hot path)

    def check(B, kx):
        x = jax.random.normal(kx, (B, OBS_DIM), jnp.float32)
        mean, log_std = actor_forward(x, prepared)
        jax.block_until_ready((mean, log_std))
        mean_ref, log_std_ref = actor_forward_ref(x, params)
        # bf16 matmul operands (f32 accumulation) -> loosened tolerance vs f32 reference.
        assert jnp.allclose(mean, mean_ref, atol=5e-2, rtol=5e-2), f"mean mismatch (B={B})"
        assert jnp.allclose(log_std, log_std_ref, atol=5e-2, rtol=5e-2), f"log_std mismatch (B={B})"
        assert mean.shape == (B, ACT_DIM) and log_std.shape == (B, ACT_DIM)
        assert bool(jnp.all(log_std >= LOG_STD_MIN - 1e-3))
        assert bool(jnp.all(log_std <= LOG_STD_MAX + 1e-3))

    check(2, k_x1)     # RL inference shape: single 128-row step, padded rows sliced away
    check(300, k_x2)   # exercises adaptive tiling (2 grid steps) + batch padding

    print("KERNEL_OK")
</pallas_src>

<mosaic_0001>
module attributes {stable_mosaic.version = 11 : i64} {
  func.func @actor_forward_kernel(%arg0: i32, %arg1: memref<128x32xbf16, #tpu.memory_space<vmem>>, %arg2: memref<32x256xbf16, #tpu.memory_space<vmem>>, %arg3: memref<1x256xf32, #tpu.memory_space<vmem>>, %arg4: memref<256x256xbf16, #tpu.memory_space<vmem>>, %arg5: memref<1x256xf32, #tpu.memory_space<vmem>>, %arg6: memref<256x256xbf16, #tpu.memory_space<vmem>>, %arg7: memref<1x256xf32, #tpu.memory_space<vmem>>, %arg8: memref<256x128xbf16, #tpu.memory_space<vmem>>, %arg9: memref<1x128xf32, #tpu.memory_space<vmem>>, %arg10: memref<128x128xf32, #tpu.memory_space<vmem>>) attributes {dimension_semantics = [#tpu.dimension_semantics<parallel>], iteration_bounds = array<i64: 1>, scalar_prefetch = 0 : i64, scratch_operands = 0 : i64, tpu.core_type = #tpu.core_type<tc>, window_params = [{transform_indices = @transform_0, window_bounds = array<i64: 128, 32>}, {pipeline_mode = #tpu.pipeline_mode<synchronous>, transform_indices = @transform_1, window_bounds = array<i64: 32, 256>}, {pipeline_mode = #tpu.pipeline_mode<synchronous>, transform_indices = @transform_2, window_bounds = array<i64: 1, 256>}, {pipeline_mode = #tpu.pipeline_mode<synchronous>, transform_indices = @transform_3, window_bounds = array<i64: 256, 256>}, {pipeline_mode = #tpu.pipeline_mode<synchronous>, transform_indices = @transform_4, window_bounds = array<i64: 1, 256>}, {pipeline_mode = #tpu.pipeline_mode<synchronous>, transform_indices = @transform_5, window_bounds = array<i64: 256, 256>}, {pipeline_mode = #tpu.pipeline_mode<synchronous>, transform_indices = @transform_6, window_bounds = array<i64: 1, 256>}, {pipeline_mode = #tpu.pipeline_mode<synchronous>, transform_indices = @transform_7, window_bounds = array<i64: 256, 128>}, {pipeline_mode = #tpu.pipeline_mode<synchronous>, transform_indices = @transform_8, window_bounds = array<i64: 1, 128>}, {transform_indices = @transform_9, window_bounds = array<i64: 128, 128>}]} {
    %c0 = arith.constant 0 : index
    %c0_0 = arith.constant 0 : index
    %0 = vector.load %arg1[%c0, %c0_0] : memref<128x32xbf16, #tpu.memory_space<vmem>>, vector<128x32xbf16>
    %c0_1 = arith.constant 0 : index
    %c0_2 = arith.constant 0 : index
    %1 = vector.load %arg2[%c0_1, %c0_2] : memref<32x256xbf16, #tpu.memory_space<vmem>>, vector<32x256xbf16>
    %cst = arith.constant dense<0.000000e+00> : vector<128x256xf32>
    %2 = tpu.matmul %0, %1, %cst {dimension_numbers = #tpu.dot_dimension_numbers<[1], [0], [0], [1], [0, 0, 1, 1], [], []>} : vector<128x32xbf16>, vector<32x256xbf16>, vector<128x256xf32> -> vector<128x256xf32>
    %c0_3 = arith.constant 0 : index
    %c0_4 = arith.constant 0 : index
    %3 = vector.load %arg3[%c0_3, %c0_4] : memref<1x256xf32, #tpu.memory_space<vmem>>, vector<1x256xf32>
    %4 = vector.broadcast %3 : vector<1x256xf32> to vector<128x256xf32>
    %5 = arith.addf %2, %4 : vector<128x256xf32>
    %cst_5 = arith.constant 0.000000e+00 : f32
    %6 = vector.broadcast %cst_5 : f32 to vector<128x256xf32>
    %7 = arith.maximumf %5, %6 : vector<128x256xf32>
    %8 = arith.truncf %7 : vector<128x256xf32> to vector<128x256xbf16>
    %c0_6 = arith.constant 0 : index
    %c0_7 = arith.constant 0 : index
    %9 = vector.load %arg4[%c0_6, %c0_7] : memref<256x256xbf16, #tpu.memory_space<vmem>>, vector<256x256xbf16>
    %cst_8 = arith.constant dense<0.000000e+00> : vector<128x256xf32>
    %10 = tpu.matmul %8, %9, %cst_8 {dimension_numbers = #tpu.dot_dimension_numbers<[1], [0], [0], [1], [0, 0, 1, 1], [], []>} : vector<128x256xbf16>, vector<256x256xbf16>, vector<128x256xf32> -> vector<128x256xf32>
    %c0_9 = arith.constant 0 : index
    %c0_10 = arith.constant 0 : index
    %11 = vector.load %arg5[%c0_9, %c0_10] : memref<1x256xf32, #tpu.memory_space<vmem>>, vector<1x256xf32>
    %12 = vector.broadcast %11 : vector<1x256xf32> to vector<128x256xf32>
    %13 = arith.addf %10, %12 : vector<128x256xf32>
    %cst_11 = arith.constant 0.000000e+00 : f32
    %14 = vector.broadcast %cst_11 : f32 to vector<128x256xf32>
    %15 = arith.maximumf %13, %14 : vector<128x256xf32>
    %16 = arith.truncf %15 : vector<128x256xf32> to vector<128x256xbf16>
    %c0_12 = arith.constant 0 : index
    %c0_13 = arith.constant 0 : index
    %17 = vector.load %arg6[%c0_12, %c0_13] : memref<256x256xbf16, #tpu.memory_space<vmem>>, vector<256x256xbf16>
    %cst_14 = arith.constant dense<0.000000e+00> : vector<128x256xf32>
    %18 = tpu.matmul %16, %17, %cst_14 {dimension_numbers = #tpu.dot_dimension_numbers<[1], [0], [0], [1], [0, 0, 1, 1], [], []>} : vector<128x256xbf16>, vector<256x256xbf16>, vector<128x256xf32> -> vector<128x256xf32>
    %c0_15 = arith.constant 0 : index
    %c0_16 = arith.constant 0 : index
    %19 = vector.load %arg7[%c0_15, %c0_16] : memref<1x256xf32, #tpu.memory_space<vmem>>, vector<1x256xf32>
    %20 = vector.broadcast %19 : vector<1x256xf32> to vector<128x256xf32>
    %21 = arith.addf %18, %20 : vector<128x256xf32>
    %cst_17 = arith.constant 0.000000e+00 : f32
    %22 = vector.broadcast %cst_17 : f32 to vector<128x256xf32>
    %23 = arith.maximumf %21, %22 : vector<128x256xf32>
    %24 = arith.truncf %23 : vector<128x256xf32> to vector<128x256xbf16>
    %c0_18 = arith.constant 0 : index
    %c0_19 = arith.constant 0 : index
    %25 = vector.load %arg8[%c0_18, %c0_19] : memref<256x128xbf16, #tpu.memory_space<vmem>>, vector<256x128xbf16>
    %cst_20 = arith.constant dense<0.000000e+00> : vector<128x128xf32>
    %26 = tpu.matmul %24, %25, %cst_20 {dimension_numbers = #tpu.dot_dimension_numbers<[1], [0], [0], [1], [0, 0, 1, 1], [], []>} : vector<128x256xbf16>, vector<256x128xbf16>, vector<128x128xf32> -> vector<128x128xf32>
    %c0_21 = arith.constant 0 : index
    %c0_22 = arith.constant 0 : index
    %27 = vector.load %arg9[%c0_21, %c0_22] : memref<1x128xf32, #tpu.memory_space<vmem>>, vector<1x128xf32>
    %28 = vector.broadcast %27 : vector<1x128xf32> to vector<128x128xf32>
    %29 = arith.addf %26, %28 : vector<128x128xf32>
    %30 = math.tanh %29 : vector<128x128xf32>
    %cst_23 = arith.constant 3.500000e+00 : f32
    %31 = vector.broadcast %cst_23 : f32 to vector<128x128xf32>
    %32 = arith.mulf %31, %30 : vector<128x128xf32>
    %cst_24 = arith.constant -1.500000e+00 : f32
    %33 = vector.broadcast %cst_24 : f32 to vector<128x128xf32>
    %34 = arith.addf %32, %33 : vector<128x128xf32>
    %35 = tpu.iota {dimensions = array<i32: 1>} : vector<128x128xi32>
    %c64_i32 = arith.constant 64 : i32
    %36 = vector.broadcast %c64_i32 : i32 to vector<128x128xi32>
    %37 = arith.cmpi sge, %35, %36 : vector<128x128xi32>
    %38 = arith.select %37, %34, %29 : vector<128x128xi1>, vector<128x128xf32>
    %c0_25 = arith.constant 0 : index
    %c0_26 = arith.constant 0 : index
    %39 = vector.load %arg10[%c0_25, %c0_26] : memref<128x128xf32, #tpu.memory_space<vmem>>, vector<128x128xf32>
    tpu.vector_store %arg10[%c0_25, %c0_26], %38 {strides = array<i32>} : memref<128x128xf32, #tpu.memory_space<vmem>>, vector<128x128xf32>,
    return
  }
  func.func @transform_0(%arg0: i32) -> (i32, i32) {
    %c0_i32 = arith.constant 0 : i32
    %c0_i32_0 = arith.constant 0 : i32
    return %arg0, %c0_i32 : i32, i32
  }
  func.func @transform_1(%arg0: i32) -> (i32, i32) {
    %c0_i32 = arith.constant 0 : i32
    %c0_i32_0 = arith.constant 0 : i32
    %c0_i32_1 = arith.constant 0 : i32
    return %c0_i32, %c0_i32_0 : i32, i32
  }
  func.func @transform_2(%arg0: i32) -> (i32, i32) {
    %c0_i32 = arith.constant 0 : i32
    %c0_i32_0 = arith.constant 0 : i32
    %c0_i32_1 = arith.constant 0 : i32
    return %c0_i32, %c0_i32_0 : i32, i32
  }
  func.func @transform_3(%arg0: i32) -> (i32, i32) {
    %c0_i32 = arith.constant 0 : i32
    %c0_i32_0 = arith.constant 0 : i32
    %c0_i32_1 = arith.constant 0 : i32
    return %c0_i32, %c0_i32_0 : i32, i32
  }
  func.func @transform_4(%arg0: i32) -> (i32, i32) {
    %c0_i32 = arith.constant 0 : i32
    %c0_i32_0 = arith.constant 0 : i32
    %c0_i32_1 = arith.constant 0 : i32
    return %c0_i32, %c0_i32_0 : i32, i32
  }
  func.func @transform_5(%arg0: i32) -> (i32, i32) {
    %c0_i32 = arith.constant 0 : i32
    %c0_i32_0 = arith.constant 0 : i32
    %c0_i32_1 = arith.constant 0 : i32
    return %c0_i32, %c0_i32_0 : i32, i32
  }
  func.func @transform_6(%arg0: i32) -> (i32, i32) {
    %c0_i32 = arith.constant 0 : i32
    %c0_i32_0 = arith.constant 0 : i32
    %c0_i32_1 = arith.constant 0 : i32
    return %c0_i32, %c0_i32_0 : i32, i32
  }
  func.func @transform_7(%arg0: i32) -> (i32, i32) {
    %c0_i32 = arith.constant 0 : i32
    %c0_i32_0 = arith.constant 0 : i32
    %c0_i32_1 = arith.constant 0 : i32
    return %c0_i32, %c0_i32_0 : i32, i32
  }
  func.func @transform_8(%arg0: i32) -> (i32, i32) {
    %c0_i32 = arith.constant 0 : i32
    %c0_i32_0 = arith.constant 0 : i32
    %c0_i32_1 = arith.constant 0 : i32
    return %c0_i32, %c0_i32_0 : i32, i32
  }
  func.func @transform_9(%arg0: i32) -> (i32, i32) {
    %c0_i32 = arith.constant 0 : i32
    %c0_i32_0 = arith.constant 0 : i32
    return %arg0, %c0_i32 : i32, i32
  }
}

</mosaic_0001>

<bundles_post_ra>
// kernel: tpu_custom_call.1
= control target key start
LH: loop header
LB: loop body
LE: loop exit
PB: predicated region body
PF: predicated region fallthrough
CT: control target
= control target key end

     0   :  { %14 = vsyncpa [#allocation3], 0  ;;  %s2490_s0 = inlined_call_operand.vmem [shape: bf16[128,32], index: 0, kind: input, shape index: {}]   ;;  %s2491_s1 = inlined_call_operand.vmem [shape: bf16[32,256], index: 1, kind: input, shape index: {}]   ;;  %s2492_s2 = inlined_call_operand.vmem [shape: f32[1,256], index: 2, kind: input, shape index: {}]   ;;  %s2493_s3 = inlined_call_operand.hbm [shape: bf16[256,256], index: 3, kind: input, shape index: {}]   ;;  %s2494_s4 = inlined_call_operand.vmem [shape: f32[1,256], index: 4, kind: input, shape index: {}]   ;;  %s2495_s5 = inlined_call_operand.hbm [shape: bf16[256,256], index: 5, kind: input, shape index: {}]   ;;  %s2496_s6 = inlined_call_operand.vmem [shape: f32[1,256], index: 6, kind: input, shape index: {}]   ;;  %s2497_s7 = inlined_call_operand.hbm [shape: bf16[256,128], index: 7, kind: input, shape index: {}]   ;;  %s2498_s8 = inlined_call_operand.vmem [shape: f32[1,128], index: 8, kind: input, shape index: {}]   ;;  %s2499_s9 = inlined_call_operand.hbm [shape: f32[128,128], index: 9, kind: output, shape index: {}]  }
   0x1   :  { %15 = vsyncpa [#allocation6], 0 }
   0x2   :  { %16 = vsyncpa [#allocation4], 0  ;;  %s42_s11 = sshll.u32 %s2495_s5, 4  ;;  %s2174_s12 = smov [#allocation5]   ;;  %s43_s11 = int_to_ptr.hbm [resolvable:$true] %s42_s11 }
   0x3   :  { %s44_s13 = sshll.u32 %s2174_s12, 4  ;;  %s27_s16 = sshll.u32 %s2493_s3, 4  ;;  %s45_s13 = int_to_ptr.vmem [resolvable:$true] %s44_s13  ;;  %s28_s16 = int_to_ptr.hbm [resolvable:$true] %s27_s16 }
   0x4   :  { %s2175_s17 = smov 128   ;;  %s2176_s18 = smov 8  }
   0x5   :  { %50 = dma.hbm_to_vmem [thread:$0]  %s43_s11, 4096, %s45_s13, [#allocation6], %s2175_s17, %s2175_s17, %s2176_s18  }
   0x6   :  { %s2177_s19 = smov [#allocation2]   ;;  %s57_s5 = sshll.u32 %s2497_s7, 4  ;;  %s58_s5 = int_to_ptr.hbm [resolvable:$true] %s57_s5 }
   0x7   :  { %s29_s20 = sshll.u32 %s2177_s19, 4  ;;  %s2178_s3 = smov [#allocation7]   ;;  %s30_s20 = int_to_ptr.vmem [resolvable:$true] %s29_s20 }
   0x8   :  { %35 = dma.hbm_to_vmem [thread:$0]  %s28_s16, 4096, %s30_s20, [#allocation3], %s2175_s17, %s2175_s17, %s2176_s18  }
   0x9   :  { %s59_s23 = sshll.u32 %s2178_s3, 4  ;;  %s2179_s24 = smov 64   ;;  %s60_s23 = int_to_ptr.vmem [resolvable:$true] %s59_s23 }
   0xa   :  { %s2180_s25 = smov 4  }
   0xb   :  { %65 = dma.hbm_to_vmem [thread:$0]  %s58_s5, 2048, %s60_s23, [#allocation6], %s2179_s24, %s2179_s24, %s2180_s25  }
   0xc   :  { %2168 = dma.done.wait [#allocation3], 4096  }
   0xd   :  { %2169 = vsyncadd [#allocation3], 4294963200 }
   0xe   :  { %2170 = dma.done.wait [#allocation6], 6144  }
   0xf   :  { %2171 = vsyncadd [#allocation6], 4294961152  ;;  %v1597_v0 = vld [vmem:[%s2491_s1 + $0x10] sm:$0xf]  ;;  %v1950_v1 = vld [vmem:[%s2491_s1 + $0x14] sm:$0xf0] }
  0x10   :  { %v1949_v2 = vld [vmem:[%s2491_s1 + $0x14] sm:$0xf]  ;;  %v1598_v3 = vor.u32 %v1950_v1, %v1597_v0  ;;  %v1599_v4 = vld [vmem:[%s2491_s1 + $0x18] sm:$0xf0]  ;;  %v1589_v5 = vld [vmem:[%s2491_s1] sm:$0xf] }
  0x11   :  { %v1948_v6 = vld [vmem:[%s2491_s1 + $0x4] sm:$0xf0]  ;;  %v1602_v7 = vor.u32 %v1949_v2, %v1599_v4  ;;  %v1947_v8 = vld [vmem:[%s2491_s1 + $0x4] sm:$0xf]  ;;  %v1591_v9 = vld [vmem:[%s2491_s1 + $0x8] sm:$0xf0] }
  0x12   :  { %198 = vmatpush.bf16.msra.mxu0 %v1598_v3  ;;  %v1590_v10 = vor.u32 %v1948_v6, %v1589_v5  ;;  %v1965_v11 = vld [vmem:[#allocation2 + $0x74] sm:$0xf]  ;;  %v1679_v12 = vld [vmem:[#allocation2 + $0x78] sm:$0xf0]  ;;  %v1594_v13 = vor.u32 %v1947_v8, %v1591_v9  ;;  %v1939_v18 = vld [vmem:[%s2490_s0] sm:$0xff]  ;;  %vm167_vm0 = vcmask 261120  }
  0x13   :  { %247 = vmatpush.bf16.msra.mxu1 %v1602_v7  ;;  %v1682_v14 = vor.u32 %v1965_v11, %v1679_v12  ;;  %v1981_v15 = vld [vmem:[#allocation2 + $0xf4] sm:$0xf]  ;;  %v1743_v16 = vld [vmem:[#allocation2 + $0xf8] sm:$0xf0]  ;;  %v1963_v19 = vld [vmem:[#allocation2 + $0x64] sm:$0xf] }
  0x14   :  { %v1746_v17 = vor.u32 %v1981_v15, %v1743_v16  ;;  %v1671_v20 = vld [vmem:[#allocation2 + $0x68] sm:$0xf0]  ;;  %v1979_v21 = vld [vmem:[#allocation2 + $0xe4] sm:$0xf]  ;;  %v1961_v26 = vld [vmem:[#allocation2 + $0x54] sm:$0xf] }
  0x15   :  { %v1674_v22 = vor.u32 %v1963_v19, %v1671_v20  ;;  %v1735_v23 = vld [vmem:[#allocation2 + $0xe8] sm:$0xf0]  ;;  %v1663_v27 = vld [vmem:[#allocation2 + $0x58] sm:$0xf0]  ;;  %v1977_v28 = vld [vmem:[#allocation2 + $0xd4] sm:$0xf] }
  0x16   :  { %199 = vmatpush.bf16.msra.mxu0 %v1590_v10  ;;  %v1738_v24 = vor.u32 %v1979_v21, %v1735_v23  ;;  %v1940_v25 = vld [vmem:[%s2490_s0 + $0x8] sm:$0xff]  ;;  %v1666_v29 = vor.u32 %v1961_v26, %v1663_v27  ;;  %v1727_v30 = vld [vmem:[#allocation2 + $0xd8] sm:$0xf0]  ;;  %v1941_v32 = vld [vmem:[%s2490_s0 + $0x10] sm:$0xff]  ;;  %s1541_s22 = sshll.u32 %s2499_s9, 4  ;;  %s1542_s22 = int_to_ptr.hbm [resolvable:$true] %s1541_s22 }
  0x17   :  { %248 = vmatpush.bf16.msra.mxu1 %v1594_v13  ;;  %v1730_v31 = vor.u32 %v1977_v28, %v1727_v30  ;;  %v1959_v33 = vld [vmem:[#allocation2 + $0x44] sm:$0xf]  ;;  %v1655_v34 = vld [vmem:[#allocation2 + $0x48] sm:$0xf0]  ;;  %v1942_v39 = vld [vmem:[%s2490_s0 + $0x18] sm:$0xff] }
  0x18   :  { %v1975_v35 = vld [vmem:[#allocation2 + $0xc4] sm:$0xf]  ;;  %v1658_v36 = vor.u32 %v1959_v33, %v1655_v34  ;;  %v1719_v37 = vld [vmem:[#allocation2 + $0xc8] sm:$0xf0]  ;;  %v1957_v40 = vld [vmem:[#allocation2 + $0x34] sm:$0xf] }
  0x19   :  { %1603 = vmatmul.msk.bf16.vlgmr.msra.gmra.mxu0 %vm167_vm0, %v1939_v18  ;;  %v1722_v38 = vor.u32 %v1975_v35, %v1719_v37  ;;  %v1647_v41 = vld [vmem:[#allocation2 + $0x38] sm:$0xf0]  ;;  %v1973_v42 = vld [vmem:[#allocation2 + $0xb4] sm:$0xf]  ;;  %v1943_v46 = vld [vmem:[%s2490_s0 + $0x20] sm:$0xff] }
  0x1a   :  { %634 = vmatpush.bf16.msrb.mxu0 %v1682_v14  ;;  %1611 = vmatmul.msk.bf16.vlgmr.msra.gmra.mxu1 %vm167_vm0, %v1939_v18  ;;  %v1650_v43 = vor.u32 %v1957_v40, %v1647_v41  ;;  %v1711_v44 = vld [vmem:[#allocation2 + $0xb8] sm:$0xf0]  ;;  %v1955_v47 = vld [vmem:[#allocation2 + $0x24] sm:$0xf]  ;;  %v1639_v48 = vld [vmem:[#allocation2 + $0x28] sm:$0xf0] }
  0x1b   :  { %683 = vmatpush.bf16.msrb.mxu1 %v1746_v17  ;;  %v1714_v45 = vor.u32 %v1973_v42, %v1711_v44  ;;  %v1971_v49 = vld [vmem:[#allocation2 + $0xa4] sm:$0xf]  ;;  %v1642_v50 = vor.u32 %v1955_v47, %v1639_v48  ;;  %v1703_v51 = vld [vmem:[#allocation2 + $0xa8] sm:$0xf0]  ;;  %v1677_v52 = vld [vmem:[#allocation2 + $0x70] sm:$0xf] }
  0x1c   :  { %v1966_v53 = vld [vmem:[#allocation2 + $0x74] sm:$0xf0]  ;;  %v1706_v54 = vor.u32 %v1971_v49, %v1703_v51  ;;  %v1741_v56 = vld [vmem:[#allocation2 + $0xf0] sm:$0xf]  ;;  %v1944_v59 = vld [vmem:[%s2490_s0 + $0x28] sm:$0xff] }
  0x1d   :  { %v1678_v55 = vor.u32 %v1966_v53, %v1677_v52  ;;  %v1982_v57 = vld [vmem:[#allocation2 + $0xf4] sm:$0xf0]  ;;  %v1669_v60 = vld [vmem:[#allocation2 + $0x60] sm:$0xf]  ;;  %v1964_v61 = vld [vmem:[#allocation2 + $0x64] sm:$0xf0] }
  0x1e   :  { %635 = vmatpush.bf16.msrb.mxu0 %v1674_v22  ;;  %v1742_v58 = vor.u32 %v1982_v57, %v1741_v56  ;;  %v1733_v62 = vld [vmem:[#allocation2 + $0xe0] sm:$0xf]  ;;  %v1670_v63 = vor.u32 %v1964_v61, %v1669_v60  ;;  %v1980_v0 = vld [vmem:[#allocation2 + $0xe4] sm:$0xf0]  ;;  %v1953_v2 = vld [vmem:[#allocation2 + $0x14] sm:$0xf] }
  0x1f   :  { %684 = vmatpush.bf16.msrb.mxu1 %v1738_v24  ;;  %536 = vmatpush.bf16.msra.mxu2 %v1678_v55  ;;  %v1734_v1 = vor.u32 %v1980_v0, %v1733_v62  ;;  %v1631_v3 = vld [vmem:[#allocation2 + $0x18] sm:$0xf0]  ;;  %v1661_v4 = vld [vmem:[#allocation2 + $0x50] sm:$0xf]  ;;  %v1962_v6 = vld [vmem:[#allocation2 + $0x54] sm:$0xf0] }
  0x20   :  { %585 = vmatpush.bf16.msra.mxu3 %v1742_v58  ;;  %v1634_v5 = vor.u32 %v1953_v2, %v1631_v3  ;;  %v1725_v7 = vld [vmem:[#allocation2 + $0xd0] sm:$0xf]  ;;  %v1978_v8 = vld [vmem:[#allocation2 + $0xd4] sm:$0xf0]  ;;  %v1662_v9 = vor.u32 %v1962_v6, %v1661_v4  ;;  %v1969_v11 = vld [vmem:[#allocation2 + $0x94] sm:$0xf] }
  0x21   :  { %v1726_v10 = vor.u32 %v1978_v8, %v1725_v7  ;;  %v1695_v12 = vld [vmem:[#allocation2 + $0x98] sm:$0xf0]  ;;  %v1653_v13 = vld [vmem:[#allocation2 + $0x40] sm:$0xf]  ;;  %v1960_v15 = vld [vmem:[#allocation2 + $0x44] sm:$0xf0] }
  0x22   :  { %636 = vmatpush.bf16.msrb.mxu0 %v1666_v29  ;;  %v1698_v14 = vor.u32 %v1969_v11, %v1695_v12  ;;  %v1717_v16 = vld [vmem:[#allocation2 + $0xc0] sm:$0xf]  ;;  %v1976_v17 = vld [vmem:[#allocation2 + $0xc4] sm:$0xf0]  ;;  %v1654_v18 = vor.u32 %v1960_v15, %v1653_v13  ;;  %v1645_v20 = vld [vmem:[#allocation2 + $0x30] sm:$0xf] }
  0x23   :  { %685 = vmatpush.bf16.msrb.mxu1 %v1730_v31  ;;  %537 = vmatpush.bf16.msra.mxu2 %v1670_v63  ;;  %v1718_v19 = vor.u32 %v1976_v17, %v1717_v16  ;;  %v1958_v21 = vld [vmem:[#allocation2 + $0x34] sm:$0xf0]  ;;  %v1709_v22 = vld [vmem:[#allocation2 + $0xb0] sm:$0xf]  ;;  %v1637_v27 = vld [vmem:[#allocation2 + $0x20] sm:$0xf] }
  0x24   :  { %586 = vmatpush.bf16.msra.mxu3 %v1734_v1  ;;  %v1945_v23 = vld [vmem:[%s2490_s0 + $0x30] sm:$0xff]  ;;  %v1646_v24 = vor.u32 %v1958_v21, %v1645_v20  ;;  %v1956_v28 = vld [vmem:[#allocation2 + $0x24] sm:$0xf0]  ;;  %v1701_v30 = vld [vmem:[#allocation2 + $0xa0] sm:$0xf] }
  0x25   :  { %v1638_v29 = vor.u32 %v1956_v28, %v1637_v27  ;;  %v1972_v31 = vld [vmem:[#allocation2 + $0xa4] sm:$0xf0]  ;;  %v1951_v33 = vld [vmem:[#allocation2 + $0x4] sm:$0xf]  ;;  %v1623_v34 = vld [vmem:[#allocation2 + $0x8] sm:$0xf0] }
  0x26   :  { %637 = vmatpush.bf16.msrb.mxu0 %v1658_v36  ;;  %v1626_v35 = vor.u32 %v1951_v33, %v1623_v34  ;;  %v1629_v36 = vld [vmem:[#allocation2 + $0x10] sm:$0xf]  ;;  %v1954_v37 = vld [vmem:[#allocation2 + $0x14] sm:$0xf0]  ;;  %v1967_v42 = vld [vmem:[#allocation2 + $0x84] sm:$0xf] }
  0x27   :  { %686 = vmatpush.bf16.msrb.mxu1 %v1722_v38  ;;  %538 = vmatpush.bf16.msra.mxu2 %v1662_v9  ;;  %v1693_v38 = vld [vmem:[#allocation2 + $0x90] sm:$0xf]  ;;  %v1970_v40 = vld [vmem:[#allocation2 + $0x94] sm:$0xf0]  ;;  %v1621_v44 = vld [vmem:[#allocation2] sm:$0xf] }
  0x28   :  { %587 = vmatpush.bf16.msra.mxu3 %v1726_v10  ;;  %v1694_v41 = vor.u32 %v1970_v40, %v1693_v38  ;;  %v1685_v47 = vld [vmem:[#allocation2 + $0x80] sm:$0xf]  ;;  %v1968_v48 = vld [vmem:[#allocation2 + $0x84] sm:$0xf0]  ;;  %v1946_v51 = vld [vmem:[%s2490_s0 + $0x38] sm:$0xff] }
  0x29   :  { %1604 = vmatmul.msk.bf16.gmra.mxu0 %vm167_vm0, %v1940_v25  ;;  %v101_v52 = vld [vmem:[%s2492_s2] sm:$0x3]  ;;  %v1805_v57 = vld [vmem:[#allocation5 + $0x70] sm:$0xf]  ;;  %v1998_v58 = vld [vmem:[#allocation5 + $0x74] sm:$0xf0] }
  0x2a   :  { %1612 = vmatmul.msk.bf16.gmra.mxu1 %vm167_vm0, %v1940_v25  ;;  %638 = vmatpush.bf16.msrb.mxu0 %v1650_v43  ;;  %v1974_v25 = vld [vmem:[#allocation2 + $0xb4] sm:$0xf0]  ;;  %v1687_v43 = vld [vmem:[#allocation2 + $0x88] sm:$0xf0]  ;;  %v2314_v55 = vperm.slane %v101_v52, 0  ;;  %v2316_v56 = vperm.slane %v101_v52, 1 }
  0x2b   :  { %687 = vmatpush.bf16.msrb.mxu1 %v1714_v45  ;;  %539 = vmatpush.bf16.msra.mxu2 %v1654_v18  ;;  %v1710_v26 = vor.u32 %v1974_v25, %v1709_v22  ;;  %v1690_v45 = vor.u32 %v1967_v42, %v1687_v43  ;;  %v1869_v60 = vld [vmem:[#allocation5 + $0xf0] sm:$0xf]  ;;  %v2014_v61 = vld [vmem:[#allocation5 + $0xf4] sm:$0xf0]  ;;  %v1997_v9 = vld [vmem:[#allocation5 + $0x74] sm:$0xf] }
  0x2c   :  { %588 = vmatpush.bf16.msra.mxu3 %v1718_v19  ;;  %v1870_v62 = vor.u32 %v2014_v61, %v1869_v60  ;;  %v1807_v10 = vld [vmem:[#allocation5 + $0x78] sm:$0xf0]  ;;  %v2013_v13 = vld [vmem:[#allocation5 + $0xf4] sm:$0xf]  ;;  %v1797_v19 = vld [vmem:[#allocation5 + $0x60] sm:$0xf] }
  0x2d   :  { %v1810_v12 = vor.u32 %v1997_v9, %v1807_v10  ;;  %v1996_v20 = vld [vmem:[#allocation5 + $0x64] sm:$0xf0]  ;;  %v1861_v22 = vld [vmem:[#allocation5 + $0xe0] sm:$0xf]  ;;  %v1863_v40 = vld [vmem:[#allocation5 + $0xe8] sm:$0xf0] }
  0x2e   :  { %639 = vmatpush.bf16.msrb.mxu0 %v1642_v50  ;;  %v1686_v50 = vor.u32 %v1968_v48, %v1685_v47  ;;  %v1798_v21 = vor.u32 %v1996_v20, %v1797_v19  ;;  %v1853_v48 = vld [vmem:[#allocation5 + $0xd0] sm:$0xf]  ;;  %v1781_v9 = vld [vmem:[#allocation5 + $0x40] sm:$0xf]  ;;  %v1992_v10 = vld [vmem:[#allocation5 + $0x44] sm:$0xf0] }
  0x2f   :  { %688 = vmatpush.bf16.msrb.mxu1 %v1706_v54  ;;  %540 = vmatpush.bf16.msra.mxu2 %v1646_v24 }
  0x30   :  { %589 = vmatpush.bf16.msra.mxu3 %v1710_v26 }
  0x32   :  { %640 = vmatpush.bf16.msrb.mxu0 %v1634_v5 }
  0x33   :  { %689 = vmatpush.bf16.msrb.mxu1 %v1698_v14  ;;  %541 = vmatpush.bf16.msra.mxu2 %v1638_v29  ;;  %v1871_v14 = vld [vmem:[#allocation5 + $0xf8] sm:$0xf0] }
  0x34   :  { %v1874_v16 = vor.u32 %v2013_v13, %v1871_v14  ;;  %v2008_v13 = vld [vmem:[#allocation5 + $0xc4] sm:$0xf0] }
  0x36   :  { %641 = vmatpush.bf16.msrb.mxu0 %v1626_v35  ;;  %v1995_v35 = vld [vmem:[#allocation5 + $0x64] sm:$0xf] }
  0x37   :  { %690 = vmatpush.bf16.msrb.mxu1 %v1690_v45  ;;  %v1789_v45 = vld [vmem:[#allocation5 + $0x50] sm:$0xf] }
  0x39   :  { %1605 = vmatmul.msk.bf16.gmra.mxu0 %vm167_vm0, %v1941_v32 }
  0x3a   :  { %1613 = vmatmul.msk.bf16.gmra.mxu1 %vm167_vm0, %v1941_v32  ;;  %v1702_v32 = vor.u32 %v1972_v31, %v1701_v30  ;;  %1076 = vmatpush.bf16.msra.mxu0 %v1810_v12  ;;  %v1845_v12 = vld [vmem:[#allocation5 + $0xc0] sm:$0xf] }
  0x3b   :  { %1125 = vmatpush.bf16.msra.mxu1 %v1874_v16  ;;  %v1846_v14 = vor.u32 %v2008_v13, %v1845_v12 }
  0x3c   :  { %590 = vmatpush.bf16.msra.mxu3 %v1702_v32 }
  0x40   :  { %591 = vmatpush.bf16.msra.mxu3 %v1694_v41 }
  0x44   :  { %592 = vmatpush.bf16.msra.mxu3 %v1686_v50 }
  0x48   :  { %1027 = vmatpush.bf16.msrb.mxu3 %v1870_v62 }
  0x49   :  { %1606 = vmatmul.msk.bf16.gmra.mxu0 %vm167_vm0, %v1942_v39 }
  0x4a   :  { %1614 = vmatmul.msk.bf16.gmra.mxu1 %vm167_vm0, %v1942_v39  ;;  %v1630_v39 = vor.u32 %v1954_v37, %v1629_v36  ;;  %v1799_v36 = vld [vmem:[#allocation5 + $0x68] sm:$0xf0] }
  0x4b   :  { %v1802_v38 = vor.u32 %v1995_v35, %v1799_v36  ;;  %v1773_v35 = vld [vmem:[#allocation5 + $0x30] sm:$0xf]  ;;  %v1990_v36 = vld [vmem:[#allocation5 + $0x34] sm:$0xf0] }
  0x4c   :  { %542 = vmatpush.bf16.msra.mxu2 %v1630_v39  ;;  %v2011_v39 = vld [vmem:[#allocation5 + $0xe4] sm:$0xf] }
  0x4d   :  { %v1866_v42 = vor.u32 %v2011_v39, %v1863_v40  ;;  %1077 = vmatpush.bf16.msra.mxu0 %v1802_v38  ;;  %v1837_v38 = vld [vmem:[#allocation5 + $0xb0] sm:$0xf]  ;;  %v2006_v39 = vld [vmem:[#allocation5 + $0xb4] sm:$0xf0] }
  0x4e   :  { %v1838_v40 = vor.u32 %v2006_v39, %v1837_v38 }
  0x4f   :  { %1126 = vmatpush.bf16.msra.mxu1 %v1866_v42 }
  0x59   :  { %1607 = vmatmul.msk.bf16.gmra.mxu0 %vm167_vm0, %v1943_v46 }
  0x5a   :  { %1615 = vmatmul.msk.bf16.gmra.mxu1 %vm167_vm0, %v1943_v46  ;;  %v1952_v46 = vld [vmem:[#allocation2 + $0x4] sm:$0xf0] }
  0x5b   :  { %v1622_v49 = vor.u32 %v1952_v46, %v1621_v44  ;;  %v1994_v46 = vld [vmem:[#allocation5 + $0x54] sm:$0xf0] }
  0x5c   :  { %v1790_v47 = vor.u32 %v1994_v46, %v1789_v45 }
  0x5d   :  { %543 = vmatpush.bf16.msra.mxu2 %v1622_v49  ;;  %v2010_v49 = vld [vmem:[#allocation5 + $0xd4] sm:$0xf0] }
  0x5e   :  { %v1854_v50 = vor.u32 %v2010_v49, %v1853_v48 }
  0x69   :  { %1608 = vmatmul.msk.bf16.gmra.mxu0 %vm167_vm0, %v1944_v59 }
  0x6a   :  { %1616 = vmatmul.msk.bf16.gmra.mxu1 %vm167_vm0, %v1944_v59  ;;  %v1806_v59 = vor.u32 %v1998_v58, %v1805_v57 }
  0x6c   :  { %978 = vmatpush.bf16.msrb.mxu2 %v1806_v59 }
  0x70   :  { %979 = vmatpush.bf16.msrb.mxu2 %v1798_v21 }
  0x74   :  { %980 = vmatpush.bf16.msrb.mxu2 %v1790_v47 }
  0x79   :  { %1609 = vmatmul.msk.bf16.gmra.mxu0 %vm167_vm0, %v1945_v23 }
  0x7a   :  { %1617 = vmatmul.msk.bf16.gmra.mxu1 %vm167_vm0, %v1945_v23  ;;  %v2012_v23 = vld [vmem:[#allocation5 + $0xe4] sm:$0xf0] }
  0x7b   :  { %v1862_v24 = vor.u32 %v2012_v23, %v1861_v22 }
  0x7d   :  { %1028 = vmatpush.bf16.msrb.mxu3 %v1862_v24 }
  0x81   :  { %1029 = vmatpush.bf16.msrb.mxu3 %v1854_v50 }
  0x85   :  { %1030 = vmatpush.bf16.msrb.mxu3 %v1846_v14 }
  0x89   :  { %1610 = vmatmul.msk.bf16.gmra.mxu0 %vm167_vm0, %v1946_v51  ;;  %1031 = vmatpush.bf16.msrb.mxu3 %v1838_v40 }
  0x8a   :  { %1618 = vmatmul.msk.bf16.gmra.mxu1 %vm167_vm0, %v1946_v51 }
  0x96   :  { %v201_v53 = vpop.f32.mrf.mxu0 }
  0x97   :  { %v250_v54 = vpop.f32.mrf.mxu1  ;;  %v202_v63 = vadd.f32 %v201_v53, %v2314_v55 }
  0x98   :  { %v251_v0 = vadd.f32 %v250_v54, %v2316_v56 }
  0x99   :  { %v290_v5 = vmax.f32 %v202_v63, 0.0  ;;  %v1993_v63 = vld [vmem:[#allocation5 + $0x54] sm:$0xf] }
  0x9a   :  { %v291_v7 = vmax.f32 %v251_v0, 0.0  ;;  %v1791_v0 = vld [vmem:[#allocation5 + $0x58] sm:$0xf0] }
  0x9e   :  { %v203_v1 = vpop.f32.mrf.mxu0 }
  0x9f   :  { %v204_v2 = vadd.f32 %v203_v1, %v2314_v55  ;;  %v252_v3 = vpop.f32.mrf.mxu1 }
  0xa0   :  { %v253_v4 = vadd.f32 %v252_v3, %v2316_v56  ;;  %v2009_v3 = vld [vmem:[#allocation5 + $0xd4] sm:$0xf] }
  0xa1   :  { %v292_v6 = vmax.f32 %v204_v2, 0.0  ;;  %v1794_v2 = vor.u32 %v1993_v63, %v1791_v0  ;;  %v1765_v63 = vld [vmem:[#allocation5 + $0x20] sm:$0xf]  ;;  %v1988_v0 = vld [vmem:[#allocation5 + $0x24] sm:$0xf0] }
  0xa2   :  { %v293_v8 = vmax.f32 %v253_v4, 0.0  ;;  %v1855_v4 = vld [vmem:[#allocation5 + $0xd8] sm:$0xf0] }
  0xa3   :  { %v322_v11 = vpack.c.bf16 %v292_v6, %v290_v5  ;;  %v1858_v6 = vor.u32 %v2009_v3, %v1855_v4  ;;  %1078 = vmatpush.bf16.msra.mxu0 %v1794_v2  ;;  %v1829_v2 = vld [vmem:[#allocation5 + $0xa0] sm:$0xf]  ;;  %v2004_v3 = vld [vmem:[#allocation5 + $0xa4] sm:$0xf0] }
  0xa4   :  { %v323_v15 = vpack.c.bf16 %v293_v8, %v291_v7  ;;  %v1830_v4 = vor.u32 %v2004_v3, %v1829_v2 }
  0xa5   :  { %544 = vmatmul.bf16.vlgmr.msra.gmra.mxu2 %v322_v11  ;;  %642 = vmatmul.bf16.vlgmr.msrb.gmra.mxu0 %v322_v11  ;;  %v1782_v11 = vor.u32 %v1992_v10, %v1781_v9 }
  0xa6   :  { %593 = vmatmul.bf16.vlgmr.msra.gmra.mxu3 %v323_v15  ;;  %691 = vmatmul.bf16.vlgmr.msrb.gmra.mxu1 %v323_v15  ;;  %v206_v17 = vpop.f32.mrf.mxu0 }
  0xa7   :  { %v255_v18 = vpop.f32.mrf.mxu1  ;;  %v207_v25 = vadd.f32 %v206_v17, %v2314_v55  ;;  %1127 = vmatpush.bf16.msra.mxu1 %v1858_v6  ;;  %981 = vmatpush.bf16.msrb.mxu2 %v1782_v11 }
  0xa8   :  { %v256_v26 = vadd.f32 %v255_v18, %v2316_v56  ;;  %1032 = vmatpush.bf16.msrb.mxu3 %v1830_v4 }
  0xa9   :  { %v294_v31 = vmax.f32 %v207_v25, 0.0  ;;  %v1991_v25 = vld [vmem:[#allocation5 + $0x44] sm:$0xf] }
  0xaa   :  { %v295_v33 = vmax.f32 %v256_v26, 0.0  ;;  %v1783_v26 = vld [vmem:[#allocation5 + $0x48] sm:$0xf0] }
  0xae   :  { %v208_v27 = vpop.f32.mrf.mxu0 }
  0xaf   :  { %v209_v28 = vadd.f32 %v208_v27, %v2314_v55  ;;  %v257_v29 = vpop.f32.mrf.mxu1 }
  0xb0   :  { %v258_v30 = vadd.f32 %v257_v29, %v2316_v56  ;;  %v2007_v29 = vld [vmem:[#allocation5 + $0xc4] sm:$0xf] }
  0xb1   :  { %v296_v32 = vmax.f32 %v209_v28, 0.0  ;;  %v1786_v28 = vor.u32 %v1991_v25, %v1783_v26  ;;  %v1986_v25 = vld [vmem:[#allocation5 + $0x14] sm:$0xf0]  ;;  %v1821_v26 = vld [vmem:[#allocation5 + $0x90] sm:$0xf] }
  0xb2   :  { %v297_v34 = vmax.f32 %v258_v30, 0.0  ;;  %v1847_v30 = vld [vmem:[#allocation5 + $0xc8] sm:$0xf0] }
  0xb3   :  { %v324_v37 = vpack.c.bf16 %v296_v32, %v294_v31  ;;  %v1850_v32 = vor.u32 %v2007_v29, %v1847_v30  ;;  %1079 = vmatpush.bf16.msra.mxu0 %v1786_v28  ;;  %v2002_v29 = vld [vmem:[#allocation5 + $0x94] sm:$0xf0]  ;;  %v1985_v30 = vld [vmem:[#allocation5 + $0x14] sm:$0xf] }
  0xb4   :  { %v325_v41 = vpack.c.bf16 %v297_v34, %v295_v33 }
  0xb5   :  { %549 = vmatmul.bf16.gmra.mxu2 %v324_v37  ;;  %647 = vmatmul.bf16.gmra.mxu0 %v324_v37  ;;  %v1774_v37 = vor.u32 %v1990_v36, %v1773_v35 }
  0xb6   :  { %598 = vmatmul.bf16.gmra.mxu3 %v325_v41  ;;  %696 = vmatmul.bf16.gmra.mxu1 %v325_v41  ;;  %v211_v43 = vpop.f32.mrf.mxu0 }
  0xb7   :  { %v260_v44 = vpop.f32.mrf.mxu1  ;;  %v212_v51 = vadd.f32 %v211_v43, %v2314_v55  ;;  %1128 = vmatpush.bf16.msra.mxu1 %v1850_v32  ;;  %982 = vmatpush.bf16.msrb.mxu2 %v1774_v37  ;;  %v1822_v32 = vor.u32 %v2002_v29, %v1821_v26 }
  0xb8   :  { %v261_v52 = vadd.f32 %v260_v44, %v2316_v56 }
  0xb9   :  { %v298_v59 = vmax.f32 %v212_v51, 0.0  ;;  %v1989_v51 = vld [vmem:[#allocation5 + $0x34] sm:$0xf]  ;;  %1033 = vmatpush.bf16.msrb.mxu3 %v1822_v32 }
  0xba   :  { %v299_v61 = vmax.f32 %v261_v52, 0.0  ;;  %v1775_v52 = vld [vmem:[#allocation5 + $0x38] sm:$0xf0] }
  0xbe   :  { %v213_v53 = vpop.f32.mrf.mxu0 }
  0xbf   :  { %v214_v54 = vadd.f32 %v213_v53, %v2314_v55  ;;  %v262_v57 = vpop.f32.mrf.mxu1 }
  0xc0   :  { %v263_v58 = vadd.f32 %v262_v57, %v2316_v56  ;;  %v2005_v57 = vld [vmem:[#allocation5 + $0xb4] sm:$0xf] }
  0xc1   :  { %v300_v60 = vmax.f32 %v214_v54, 0.0  ;;  %v1778_v54 = vor.u32 %v1989_v51, %v1775_v52  ;;  %v1749_v52 = vld [vmem:[#allocation5] sm:$0xf] }
  0xc2   :  { %v301_v62 = vmax.f32 %v263_v58, 0.0  ;;  %v1839_v58 = vld [vmem:[#allocation5 + $0xb8] sm:$0xf0] }
  0xc3   :  { %v326_v1 = vpack.c.bf16 %v300_v60, %v298_v59  ;;  %v1842_v60 = vor.u32 %v2005_v57, %v1839_v58  ;;  %1080 = vmatpush.bf16.msra.mxu0 %v1778_v54 }
  0xc4   :  { %v327_v5 = vpack.c.bf16 %v301_v62, %v299_v61 }
  0xc5   :  { %554 = vmatmul.bf16.gmra.mxu2 %v326_v1  ;;  %652 = vmatmul.bf16.gmra.mxu0 %v326_v1  ;;  %v1766_v1 = vor.u32 %v1988_v0, %v1765_v63 }
  0xc6   :  { %603 = vmatmul.bf16.gmra.mxu3 %v327_v5  ;;  %701 = vmatmul.bf16.gmra.mxu1 %v327_v5  ;;  %v216_v7 = vpop.f32.mrf.mxu0 }
  0xc7   :  { %v265_v8 = vpop.f32.mrf.mxu1  ;;  %v217_v15 = vadd.f32 %v216_v7, %v2314_v55  ;;  %1129 = vmatpush.bf16.msra.mxu1 %v1842_v60  ;;  %983 = vmatpush.bf16.msrb.mxu2 %v1766_v1  ;;  %v2000_v60 = vld [vmem:[#allocation5 + $0x84] sm:$0xf0]  ;;  %v1815_v1 = vld [vmem:[#allocation5 + $0x88] sm:$0xf0] }
  0xc8   :  { %v266_v16 = vadd.f32 %v265_v8, %v2316_v56 }
  0xc9   :  { %v302_v21 = vmax.f32 %v217_v15, 0.0  ;;  %v1987_v15 = vld [vmem:[#allocation5 + $0x24] sm:$0xf] }
  0xca   :  { %v303_v23 = vmax.f32 %v266_v16, 0.0  ;;  %v1767_v16 = vld [vmem:[#allocation5 + $0x28] sm:$0xf0] }
  0xce   :  { %v218_v17 = vpop.f32.mrf.mxu0 }
  0xcf   :  { %v219_v18 = vadd.f32 %v218_v17, %v2314_v55  ;;  %v267_v19 = vpop.f32.mrf.mxu1 }
  0xd0   :  { %v268_v20 = vadd.f32 %v267_v19, %v2316_v56  ;;  %v2003_v19 = vld [vmem:[#allocation5 + $0xa4] sm:$0xf] }
  0xd1   :  { %v304_v22 = vmax.f32 %v219_v18, 0.0  ;;  %v1770_v18 = vor.u32 %v1987_v15, %v1767_v16 }
  0xd2   :  { %v305_v24 = vmax.f32 %v268_v20, 0.0  ;;  %v1831_v20 = vld [vmem:[#allocation5 + $0xa8] sm:$0xf0] }
  0xd3   :  { %v328_v27 = vpack.c.bf16 %v304_v22, %v302_v21  ;;  %v1834_v22 = vor.u32 %v2003_v19, %v1831_v20  ;;  %1081 = vmatpush.bf16.msra.mxu0 %v1770_v18 }
  0xd4   :  { %v329_v31 = vpack.c.bf16 %v305_v24, %v303_v23  ;;  %v1757_v24 = vld [vmem:[#allocation5 + $0x10] sm:$0xf] }
  0xd5   :  { %559 = vmatmul.bf16.gmra.mxu2 %v328_v27  ;;  %657 = vmatmul.bf16.gmra.mxu0 %v328_v27  ;;  %v1758_v28 = vor.u32 %v1986_v25, %v1757_v24 }
  0xd6   :  { %608 = vmatmul.bf16.gmra.mxu3 %v329_v31  ;;  %706 = vmatmul.bf16.gmra.mxu1 %v329_v31  ;;  %v221_v33 = vpop.f32.mrf.mxu0  ;;  %v1759_v31 = vld [vmem:[#allocation5 + $0x18] sm:$0xf0] }
  0xd7   :  { %v270_v34 = vpop.f32.mrf.mxu1  ;;  %v222_v41 = vadd.f32 %v221_v33, %v2314_v55  ;;  %1130 = vmatpush.bf16.msra.mxu1 %v1834_v22  ;;  %v1762_v33 = vor.u32 %v1985_v30, %v1759_v31  ;;  %984 = vmatpush.bf16.msrb.mxu2 %v1758_v28  ;;  %v2030_v28 = vld [vmem:[#allocation7 + $0x78] sm:$0xff] }
  0xd8   :  { %v271_v42 = vadd.f32 %v270_v34, %v2316_v56 }
  0xd9   :  { %v306_v47 = vmax.f32 %v222_v41, 0.0  ;;  %1082 = vmatpush.bf16.msra.mxu0 %v1762_v33 }
  0xda   :  { %v307_v49 = vmax.f32 %v271_v42, 0.0 }
  0xde   :  { %v223_v43 = vpop.f32.mrf.mxu0 }
  0xdf   :  { %v224_v44 = vadd.f32 %v223_v43, %v2314_v55  ;;  %v272_v45 = vpop.f32.mrf.mxu1 }
  0xe0   :  { %v273_v46 = vadd.f32 %v272_v45, %v2316_v56 }
  0xe1   :  { %v308_v48 = vmax.f32 %v224_v44, 0.0 }
  0xe2   :  { %v309_v50 = vmax.f32 %v273_v46, 0.0 }
  0xe3   :  { %v330_v53 = vpack.c.bf16 %v308_v48, %v306_v47  ;;  %v2001_v48 = vld [vmem:[#allocation5 + $0x94] sm:$0xf] }
  0xe4   :  { %v331_v59 = vpack.c.bf16 %v309_v50, %v307_v49  ;;  %v1823_v49 = vld [vmem:[#allocation5 + $0x98] sm:$0xf0] }
  0xe5   :  { %564 = vmatmul.bf16.gmra.mxu2 %v330_v53  ;;  %662 = vmatmul.bf16.gmra.mxu0 %v330_v53  ;;  %v1826_v50 = vor.u32 %v2001_v48, %v1823_v49  ;;  %v1984_v53 = vld [vmem:[#allocation5 + $0x4] sm:$0xf0] }
  0xe6   :  { %613 = vmatmul.bf16.gmra.mxu3 %v331_v59  ;;  %711 = vmatmul.bf16.gmra.mxu1 %v331_v59  ;;  %v226_v61 = vpop.f32.mrf.mxu0  ;;  %v1750_v58 = vor.u32 %v1984_v53, %v1749_v52  ;;  %v1813_v59 = vld [vmem:[#allocation5 + $0x80] sm:$0xf]  ;;  %v2029_v52 = vld [vmem:[#allocation7 + $0x70] sm:$0xff] }
  0xe7   :  { %v275_v62 = vpop.f32.mrf.mxu1  ;;  %v227_v5 = vadd.f32 %v226_v61, %v2314_v55  ;;  %1131 = vmatpush.bf16.msra.mxu1 %v1826_v50  ;;  %v1999_v61 = vld [vmem:[#allocation5 + $0x84] sm:$0xf]  ;;  %v1814_v0 = vor.u32 %v2000_v60, %v1813_v59 }
  0xe8   :  { %v276_v6 = vadd.f32 %v275_v62, %v2316_v56  ;;  %985 = vmatpush.bf16.msrb.mxu2 %v1750_v58  ;;  %v1818_v3 = vor.u32 %v1999_v61, %v1815_v1 }
  0xe9   :  { %v310_v11 = vmax.f32 %v227_v5, 0.0  ;;  %1034 = vmatpush.bf16.msrb.mxu3 %v1814_v0 }
  0xea   :  { %v311_v13 = vmax.f32 %v276_v6, 0.0 }
  0xeb   :  { %1132 = vmatpush.bf16.msra.mxu1 %v1818_v3 }
  0xed   :  { %1403 = vmatpush.bf16.msra.mxu3 %v2030_v28 }
  0xee   :  { %v228_v7 = vpop.f32.mrf.mxu0 }
  0xef   :  { %v229_v8 = vadd.f32 %v228_v7, %v2314_v55  ;;  %v277_v9 = vpop.f32.mrf.mxu1 }
  0xf0   :  { %v278_v10 = vadd.f32 %v277_v9, %v2316_v56 }
  0xf1   :  { %v312_v12 = vmax.f32 %v229_v8, 0.0  ;;  %1404 = vmatpush.bf16.msra.mxu3 %v2029_v52 }
  0xf2   :  { %v313_v14 = vmax.f32 %v278_v10, 0.0  ;;  %v1983_v10 = vld [vmem:[#allocation5 + $0x4] sm:$0xf] }
  0xf3   :  { %v332_v17 = vpack.c.bf16 %v312_v12, %v310_v11  ;;  %v1751_v11 = vld [vmem:[#allocation5 + $0x8] sm:$0xf0] }
  0xf4   :  { %v333_v21 = vpack.c.bf16 %v313_v14, %v311_v13 }
  0xf5   :  { %569 = vmatmul.bf16.gmra.mxu2 %v332_v17  ;;  %667 = vmatmul.bf16.gmra.mxu0 %v332_v17 }
  0xf6   :  { %618 = vmatmul.bf16.gmra.mxu3 %v333_v21  ;;  %716 = vmatmul.bf16.gmra.mxu1 %v333_v21  ;;  %v231_v23 = vpop.f32.mrf.mxu0 }
  0xf7   :  { %v280_v27 = vpop.f32.mrf.mxu1  ;;  %v232_v34 = vadd.f32 %v231_v23, %v2314_v55 }
  0xf8   :  { %v281_v35 = vadd.f32 %v280_v27, %v2316_v56  ;;  %v2022_v27 = vld [vmem:[#allocation7 + $0x38] sm:$0xff] }
  0xf9   :  { %v314_v40 = vmax.f32 %v232_v34, 0.0  ;;  %1354 = vmatpush.bf16.msra.mxu2 %v2022_v27 }
  0xfa   :  { %v315_v42 = vmax.f32 %v281_v35, 0.0 }
  0xfe   :  { %v233_v36 = vpop.f32.mrf.mxu0 }
  0xff   :  { %v234_v37 = vadd.f32 %v233_v36, %v2314_v55  ;;  %v282_v38 = vpop.f32.mrf.mxu1 }
 0x100   :  { %v283_v39 = vadd.f32 %v282_v38, %v2316_v56 }
 0x101   :  { %v316_v41 = vmax.f32 %v234_v37, 0.0 }
 0x102   :  { %v317_v43 = vmax.f32 %v283_v39, 0.0 }
 0x103   :  { %v334_v44 = vpack.c.bf16 %v316_v41, %v314_v40 }
 0x104   :  { %v335_v45 = vpack.c.bf16 %v317_v43, %v315_v42 }
 0x105   :  { %574 = vmatmul.bf16.gmra.mxu2 %v334_v44  ;;  %672 = vmatmul.bf16.gmra.mxu0 %v334_v44 }
 0x106   :  { %623 = vmatmul.bf16.gmra.mxu3 %v335_v45  ;;  %721 = vmatmul.bf16.gmra.mxu1 %v335_v45  ;;  %v236_v46 = vpop.f32.mrf.mxu0 }
 0x107   :  { %v285_v47 = vpop.f32.mrf.mxu1  ;;  %v237_v51 = vadd.f32 %v236_v46, %v2314_v55 }
 0x108   :  { %v286_v54 = vadd.f32 %v285_v47, %v2316_v56 }
 0x109   :  { %v318_v4 = vmax.f32 %v237_v51, 0.0  ;;  %v2021_v51 = vld [vmem:[#allocation7 + $0x30] sm:$0xff] }
 0x10a   :  { %v319_v6 = vmax.f32 %v286_v54, 0.0  ;;  %1355 = vmatpush.bf16.msra.mxu2 %v2021_v51 }
 0x10e   :  { %v238_v57 = vpop.f32.mrf.mxu0 }
 0x10f   :  { %v239_v62 = vadd.f32 %v238_v57, %v2314_v55  ;;  %v287_v63 = vpop.f32.mrf.mxu1  ;;  %v1754_v55 = vor.u32 %v1983_v10, %v1751_v11 }
 0x110   :  { %v288_v2 = vadd.f32 %v287_v63, %v2316_v56  ;;  %v370_v56 = vld [vmem:[%s2494_s4] sm:$0x3] }
 0x111   :  { %v320_v5 = vmax.f32 %v239_v62, 0.0  ;;  %1083 = vmatpush.bf16.msra.mxu0 %v1754_v55  ;;  %v2353_v13 = vperm.slane %v370_v56, 1  ;;  %v2356_v17 = vperm.slane %v370_v56, 0 }
 0x112   :  { %v321_v7 = vmax.f32 %v288_v2, 0.0 }
 0x113   :  { %v336_v8 = vpack.c.bf16 %v320_v5, %v318_v4 }
 0x114   :  { %v337_v9 = vpack.c.bf16 %v321_v7, %v319_v6 }
 0x115   :  { %579 = vmatmul.bf16.gmra.mxu2 %v336_v8  ;;  %677 = vmatmul.bf16.gmra.mxu0 %v336_v8 }
 0x116   :  { %628 = vmatmul.bf16.gmra.mxu3 %v337_v9  ;;  %726 = vmatmul.bf16.gmra.mxu1 %v337_v9 }
 0x122   :  { %v643_v12 = vpop.f32.mrf.mxu0 }
 0x123   :  { %v692_v14 = vpop.f32.mrf.mxu1  ;;  %v644_v15 = vadd.f32 %v643_v12, %v2353_v13 }
 0x125   :  { %v693_v20 = vadd.f32 %v692_v14, %v644_v15 }
 0x127   :  { %v733_v25 = vmax.f32 %v693_v20, 0.0 }
 0x128   :  { %v545_v16 = vpop.f32.mrf.mxu2 }
 0x129   :  { %v594_v18 = vpop.f32.mrf.mxu3  ;;  %v546_v23 = vadd.f32 %v545_v16, %v2356_v17 }
 0x12a   :  { %v645_v19 = vpop.f32.mrf.mxu0 }
 0x12b   :  { %v646_v21 = vadd.f32 %v645_v19, %v2353_v13  ;;  %v694_v22 = vpop.f32.mrf.mxu1  ;;  %v595_v30 = vadd.f32 %v594_v18, %v546_v23  ;;  %v2020_v18 = vld [vmem:[#allocation7 + $0x28] sm:$0xff] }
 0x12c   :  { %v2028_v19 = vld [vmem:[#allocation7 + $0x68] sm:$0xff]  ;;  %1356 = vmatpush.bf16.msra.mxu2 %v2020_v18 }
 0x12d   :  { %v695_v24 = vadd.f32 %v694_v22, %v646_v21  ;;  %v732_v37 = vmax.f32 %v595_v30, 0.0  ;;  %1405 = vmatpush.bf16.msra.mxu3 %v2028_v19 }
 0x12f   :  { %v735_v26 = vmax.f32 %v695_v24, 0.0 }
 0x130   :  { %v547_v29 = vpop.f32.mrf.mxu2 }
 0x131   :  { %v548_v31 = vadd.f32 %v547_v29, %v2356_v17  ;;  %v596_v32 = vpop.f32.mrf.mxu3  ;;  %v765_v33 = vpack.c.bf16 %v735_v26, %v733_v25 }
 0x132   :  { %v648_v34 = vpop.f32.mrf.mxu0 }
 0x133   :  { %v597_v35 = vadd.f32 %v596_v32, %v548_v31  ;;  %v697_v36 = vpop.f32.mrf.mxu1  ;;  %1035 = vmatmul.bf16.vlgmr.msrb.gmra.mxu3 %v765_v33  ;;  %1133 = vmatmul.bf16.vlgmr.msra.gmra.mxu1 %v765_v33  ;;  %v649_v39 = vadd.f32 %v648_v34, %v2353_v13 }
 0x135   :  { %v734_v38 = vmax.f32 %v597_v35, 0.0  ;;  %v698_v44 = vadd.f32 %v697_v36, %v649_v39 }
 0x137   :  { %v764_v40 = vpack.c.bf16 %v734_v38, %v732_v37  ;;  %v737_v49 = vmax.f32 %v698_v44, 0.0 }
 0x138   :  { %v550_v41 = vpop.f32.mrf.mxu2 }
 0x139   :  { %v599_v42 = vpop.f32.mrf.mxu3  ;;  %986 = vmatmul.bf16.vlgmr.msrb.gmra.mxu2 %v764_v40  ;;  %1084 = vmatmul.bf16.vlgmr.msra.gmra.mxu0 %v764_v40  ;;  %v551_v47 = vadd.f32 %v550_v41, %v2356_v17 }
 0x13a   :  { %v650_v43 = vpop.f32.mrf.mxu0 }
 0x13b   :  { %v651_v45 = vadd.f32 %v650_v43, %v2353_v13  ;;  %v699_v46 = vpop.f32.mrf.mxu1  ;;  %v600_v54 = vadd.f32 %v599_v42, %v551_v47  ;;  %v2019_v42 = vld [vmem:[#allocation7 + $0x20] sm:$0xff] }
 0x13c   :  { %v2027_v43 = vld [vmem:[#allocation7 + $0x60] sm:$0xff]  ;;  %1357 = vmatpush.bf16.msra.mxu2 %v2019_v42 }
 0x13d   :  { %v700_v48 = vadd.f32 %v699_v46, %v651_v45  ;;  %v736_v63 = vmax.f32 %v600_v54, 0.0  ;;  %1406 = vmatpush.bf16.msra.mxu3 %v2027_v43 }
 0x13f   :  { %v739_v50 = vmax.f32 %v700_v48, 0.0 }
 0x140   :  { %v552_v53 = vpop.f32.mrf.mxu2 }
 0x141   :  { %v553_v57 = vadd.f32 %v552_v53, %v2356_v17  ;;  %v601_v58 = vpop.f32.mrf.mxu3  ;;  %v767_v59 = vpack.c.bf16 %v739_v50, %v737_v49 }
 0x142   :  { %v653_v60 = vpop.f32.mrf.mxu0 }
 0x143   :  { %v602_v61 = vadd.f32 %v601_v58, %v553_v57  ;;  %v702_v62 = vpop.f32.mrf.mxu1  ;;  %1040 = vmatmul.bf16.gmra.mxu3 %v767_v59  ;;  %1138 = vmatmul.bf16.gmra.mxu1 %v767_v59  ;;  %v654_v1 = vadd.f32 %v653_v60, %v2353_v13 }
 0x145   :  { %v738_v0 = vmax.f32 %v602_v61, 0.0  ;;  %v703_v6 = vadd.f32 %v702_v62, %v654_v1 }
 0x147   :  { %v766_v2 = vpack.c.bf16 %v738_v0, %v736_v63  ;;  %v741_v11 = vmax.f32 %v703_v6, 0.0 }
 0x148   :  { %v555_v3 = vpop.f32.mrf.mxu2 }
 0x149   :  { %v604_v4 = vpop.f32.mrf.mxu3  ;;  %991 = vmatmul.bf16.gmra.mxu2 %v766_v2  ;;  %1089 = vmatmul.bf16.gmra.mxu0 %v766_v2  ;;  %v556_v9 = vadd.f32 %v555_v3, %v2356_v17 }
 0x14a   :  { %v655_v5 = vpop.f32.mrf.mxu0 }
 0x14b   :  { %v656_v7 = vadd.f32 %v655_v5, %v2353_v13  ;;  %v704_v8 = vpop.f32.mrf.mxu1  ;;  %v605_v12 = vadd.f32 %v604_v4, %v556_v9  ;;  %v2018_v4 = vld [vmem:[#allocation7 + $0x18] sm:$0xff] }
 0x14c   :  { %v2026_v5 = vld [vmem:[#allocation7 + $0x58] sm:$0xff]  ;;  %1358 = vmatpush.bf16.msra.mxu2 %v2018_v4 }
 0x14d   :  { %v705_v10 = vadd.f32 %v704_v8, %v656_v7  ;;  %v740_v23 = vmax.f32 %v605_v12, 0.0  ;;  %1407 = vmatpush.bf16.msra.mxu3 %v2026_v5 }
 0x14f   :  { %v743_v55 = vmax.f32 %v705_v10, 0.0 }
 0x150   :  { %v557_v56 = vpop.f32.mrf.mxu2 }
 0x151   :  { %v558_v14 = vadd.f32 %v557_v56, %v2356_v17  ;;  %v606_v15 = vpop.f32.mrf.mxu3  ;;  %v769_v16 = vpack.c.bf16 %v743_v55, %v741_v11 }
 0x152   :  { %v658_v20 = vpop.f32.mrf.mxu0 }
 0x153   :  { %v607_v21 = vadd.f32 %v606_v15, %v558_v14  ;;  %v707_v22 = vpop.f32.mrf.mxu1  ;;  %1045 = vmatmul.bf16.gmra.mxu3 %v769_v16  ;;  %1143 = vmatmul.bf16.gmra.mxu1 %v769_v16  ;;  %v659_v25 = vadd.f32 %v658_v20, %v2353_v13 }
 0x155   :  { %v742_v24 = vmax.f32 %v607_v21, 0.0  ;;  %v708_v30 = vadd.f32 %v707_v22, %v659_v25 }
 0x157   :  { %v768_v26 = vpack.c.bf16 %v742_v24, %v740_v23  ;;  %v745_v35 = vmax.f32 %v708_v30, 0.0 }
 0x158   :  { %v560_v27 = vpop.f32.mrf.mxu2 }
 0x159   :  { %v609_v28 = vpop.f32.mrf.mxu3  ;;  %996 = vmatmul.bf16.gmra.mxu2 %v768_v26  ;;  %1094 = vmatmul.bf16.gmra.mxu0 %v768_v26  ;;  %v561_v33 = vadd.f32 %v560_v27, %v2356_v17 }
 0x15a   :  { %v660_v29 = vpop.f32.mrf.mxu0 }
 0x15b   :  { %v661_v31 = vadd.f32 %v660_v29, %v2353_v13  ;;  %v709_v32 = vpop.f32.mrf.mxu1  ;;  %v610_v38 = vadd.f32 %v609_v28, %v561_v33  ;;  %v2017_v28 = vld [vmem:[#allocation7 + $0x10] sm:$0xff] }
 0x15c   :  { %v2025_v29 = vld [vmem:[#allocation7 + $0x50] sm:$0xff]  ;;  %1359 = vmatpush.bf16.msra.mxu2 %v2017_v28 }
 0x15d   :  { %v710_v34 = vadd.f32 %v709_v32, %v661_v31  ;;  %v744_v47 = vmax.f32 %v610_v38, 0.0  ;;  %1408 = vmatpush.bf16.msra.mxu3 %v2025_v29 }
 0x15f   :  { %v747_v36 = vmax.f32 %v710_v34, 0.0 }
 0x160   :  { %v562_v37 = vpop.f32.mrf.mxu2 }
 0x161   :  { %v563_v39 = vadd.f32 %v562_v37, %v2356_v17  ;;  %v611_v40 = vpop.f32.mrf.mxu3  ;;  %v771_v41 = vpack.c.bf16 %v747_v36, %v745_v35 }
 0x162   :  { %v663_v44 = vpop.f32.mrf.mxu0 }
 0x163   :  { %v612_v45 = vadd.f32 %v611_v40, %v563_v39  ;;  %v712_v46 = vpop.f32.mrf.mxu1  ;;  %1050 = vmatmul.bf16.gmra.mxu3 %v771_v41  ;;  %1148 = vmatmul.bf16.gmra.mxu1 %v771_v41  ;;  %v664_v49 = vadd.f32 %v663_v44, %v2353_v13  ;;  %v2016_v39 = vld [vmem:[#allocation7 + $0x8] sm:$0xff] }
 0x164   :  { %v2024_v40 = vld [vmem:[#allocation7 + $0x48] sm:$0xff]  ;;  %1360 = vmatpush.bf16.msra.mxu2 %v2016_v39 }
 0x165   :  { %v746_v48 = vmax.f32 %v612_v45, 0.0  ;;  %v713_v54 = vadd.f32 %v712_v46, %v664_v49  ;;  %1409 = vmatpush.bf16.msra.mxu3 %v2024_v40 }
 0x167   :  { %v770_v50 = vpack.c.bf16 %v746_v48, %v744_v47  ;;  %v749_v61 = vmax.f32 %v713_v54, 0.0 }
 0x168   :  { %v565_v51 = vpop.f32.mrf.mxu2 }
 0x169   :  { %v614_v52 = vpop.f32.mrf.mxu3  ;;  %1001 = vmatmul.bf16.gmra.mxu2 %v770_v50  ;;  %1099 = vmatmul.bf16.gmra.mxu0 %v770_v50  ;;  %v566_v59 = vadd.f32 %v565_v51, %v2356_v17 }
 0x16a   :  { %v665_v53 = vpop.f32.mrf.mxu0 }
 0x16b   :  { %v666_v57 = vadd.f32 %v665_v53, %v2353_v13  ;;  %v714_v58 = vpop.f32.mrf.mxu1  ;;  %v615_v0 = vadd.f32 %v614_v52, %v566_v59 }
 0x16d   :  { %v715_v60 = vadd.f32 %v714_v58, %v666_v57  ;;  %v748_v9 = vmax.f32 %v615_v0, 0.0 }
 0x16f   :  { %v751_v62 = vmax.f32 %v715_v60, 0.0 }
 0x170   :  { %v567_v63 = vpop.f32.mrf.mxu2 }
 0x171   :  { %v773_v1 = vpack.c.bf16 %v751_v62, %v749_v61  ;;  %v568_v2 = vadd.f32 %v567_v63, %v2356_v17  ;;  %v616_v3 = vpop.f32.mrf.mxu3 }
 0x172   :  { %v668_v6 = vpop.f32.mrf.mxu0 }
 0x173   :  { %v617_v7 = vadd.f32 %v616_v3, %v568_v2  ;;  %v717_v8 = vpop.f32.mrf.mxu1  ;;  %1055 = vmatmul.bf16.gmra.mxu3 %v773_v1  ;;  %1153 = vmatmul.bf16.gmra.mxu1 %v773_v1  ;;  %v669_v11 = vadd.f32 %v668_v6, %v2353_v13 }
 0x175   :  { %v750_v10 = vmax.f32 %v617_v7, 0.0  ;;  %v718_v15 = vadd.f32 %v717_v8, %v669_v11 }
 0x177   :  { %v772_v55 = vpack.c.bf16 %v750_v10, %v748_v9  ;;  %v753_v21 = vmax.f32 %v718_v15, 0.0  ;;  %v2023_v15 = vld [vmem:[#allocation7 + $0x40] sm:$0xff] }
 0x178   :  { %v570_v56 = vpop.f32.mrf.mxu2  ;;  %1410 = vmatpush.bf16.msra.mxu3 %v2023_v15 }
 0x179   :  { %v619_v12 = vpop.f32.mrf.mxu3  ;;  %1006 = vmatmul.bf16.gmra.mxu2 %v772_v55  ;;  %1104 = vmatmul.bf16.gmra.mxu0 %v772_v55  ;;  %v571_v19 = vadd.f32 %v570_v56, %v2356_v17  ;;  %v2015_v56 = vld [vmem:[#allocation7] sm:$0xff] }
 0x17a   :  { %v670_v14 = vpop.f32.mrf.mxu0  ;;  %1361 = vmatpush.bf16.msra.mxu2 %v2015_v56 }
 0x17b   :  { %v671_v16 = vadd.f32 %v670_v14, %v2353_v13  ;;  %v719_v18 = vpop.f32.mrf.mxu1  ;;  %v620_v24 = vadd.f32 %v619_v12, %v571_v19 }
 0x17d   :  { %v720_v20 = vadd.f32 %v719_v18, %v671_v16  ;;  %v752_v33 = vmax.f32 %v620_v24, 0.0 }
 0x17f   :  { %v755_v22 = vmax.f32 %v720_v20, 0.0  ;;  %v812_v20 = vld [vmem:[%s2496_s6] sm:$0x3] }
 0x180   :  { %v572_v23 = vpop.f32.mrf.mxu2 }
 0x181   :  { %v775_v25 = vpack.c.bf16 %v755_v22, %v753_v21  ;;  %v573_v26 = vadd.f32 %v572_v23, %v2356_v17  ;;  %v621_v27 = vpop.f32.mrf.mxu3  ;;  %v2392_v22 = vperm.slane %v812_v20, 1 }
 0x182   :  { %v673_v30 = vpop.f32.mrf.mxu0 }
 0x183   :  { %v622_v31 = vadd.f32 %v621_v27, %v573_v26  ;;  %v722_v32 = vpop.f32.mrf.mxu1  ;;  %1060 = vmatmul.bf16.gmra.mxu3 %v775_v25  ;;  %1158 = vmatmul.bf16.gmra.mxu1 %v775_v25  ;;  %v674_v35 = vadd.f32 %v673_v30, %v2353_v13  ;;  %v2395_v26 = vperm.slane %v812_v20, 0 }
 0x185   :  { %v754_v34 = vmax.f32 %v622_v31, 0.0  ;;  %v723_v42 = vadd.f32 %v722_v32, %v674_v35 }
 0x187   :  { %v774_v36 = vpack.c.bf16 %v754_v34, %v752_v33  ;;  %v757_v47 = vmax.f32 %v723_v42, 0.0 }
 0x188   :  { %v575_v37 = vpop.f32.mrf.mxu2 }
 0x189   :  { %v624_v38 = vpop.f32.mrf.mxu3  ;;  %1011 = vmatmul.bf16.gmra.mxu2 %v774_v36  ;;  %1109 = vmatmul.bf16.gmra.mxu0 %v774_v36  ;;  %v576_v45 = vadd.f32 %v575_v37, %v2356_v17 }
 0x18a   :  { %v675_v41 = vpop.f32.mrf.mxu0 }
 0x18b   :  { %v676_v43 = vadd.f32 %v675_v41, %v2353_v13  ;;  %v724_v44 = vpop.f32.mrf.mxu1  ;;  %v625_v50 = vadd.f32 %v624_v38, %v576_v45 }
 0x18d   :  { %v725_v46 = vadd.f32 %v724_v44, %v676_v43  ;;  %v756_v59 = vmax.f32 %v625_v50, 0.0 }
 0x18f   :  { %v759_v48 = vmax.f32 %v725_v46, 0.0 }
 0x190   :  { %v577_v49 = vpop.f32.mrf.mxu2 }
 0x191   :  { %v777_v51 = vpack.c.bf16 %v759_v48, %v757_v47  ;;  %v578_v52 = vadd.f32 %v577_v49, %v2356_v17  ;;  %v626_v53 = vpop.f32.mrf.mxu3 }
 0x192   :  { %v678_v54 = vpop.f32.mrf.mxu0 }
 0x193   :  { %v627_v57 = vadd.f32 %v626_v53, %v578_v52  ;;  %v727_v58 = vpop.f32.mrf.mxu1  ;;  %1065 = vmatmul.bf16.gmra.mxu3 %v777_v51  ;;  %1163 = vmatmul.bf16.gmra.mxu1 %v777_v51  ;;  %v679_v61 = vadd.f32 %v678_v54, %v2353_v13 }
 0x195   :  { %v758_v60 = vmax.f32 %v627_v57, 0.0  ;;  %v728_v2 = vadd.f32 %v727_v58, %v679_v61 }
 0x197   :  { %v776_v62 = vpack.c.bf16 %v758_v60, %v756_v59  ;;  %v761_v7 = vmax.f32 %v728_v2, 0.0 }
 0x198   :  { %v580_v63 = vpop.f32.mrf.mxu2 }
 0x199   :  { %v629_v0 = vpop.f32.mrf.mxu3  ;;  %1016 = vmatmul.bf16.gmra.mxu2 %v776_v62  ;;  %1114 = vmatmul.bf16.gmra.mxu0 %v776_v62  ;;  %v581_v5 = vadd.f32 %v580_v63, %v2356_v17 }
 0x19a   :  { %v680_v1 = vpop.f32.mrf.mxu0 }
 0x19b   :  { %v681_v3 = vadd.f32 %v680_v1, %v2353_v13  ;;  %v729_v4 = vpop.f32.mrf.mxu1  ;;  %v630_v10 = vadd.f32 %v629_v0, %v581_v5 }
 0x19d   :  { %v730_v6 = vadd.f32 %v729_v4, %v681_v3  ;;  %v760_v16 = vmax.f32 %v630_v10, 0.0 }
 0x19f   :  { %v763_v8 = vmax.f32 %v730_v6, 0.0 }
 0x1a0   :  { %v582_v9 = vpop.f32.mrf.mxu2 }
 0x1a1   :  { %v779_v11 = vpack.c.bf16 %v763_v8, %v761_v7  ;;  %v583_v55 = vadd.f32 %v582_v9, %v2356_v17  ;;  %v631_v12 = vpop.f32.mrf.mxu3 }
 0x1a3   :  { %v632_v14 = vadd.f32 %v631_v12, %v583_v55  ;;  %1070 = vmatmul.bf16.gmra.mxu3 %v779_v11  ;;  %1168 = vmatmul.bf16.gmra.mxu1 %v779_v11 }
 0x1a5   :  { %v762_v13 = vmax.f32 %v632_v14, 0.0 }
 0x1a7   :  { %v778_v18 = vpack.c.bf16 %v762_v13, %v760_v16 }
 0x1a9   :  { %1021 = vmatmul.bf16.gmra.mxu2 %v778_v18  ;;  %1119 = vmatmul.bf16.gmra.mxu0 %v778_v18 }
 0x1b0   :  { %v1134_v19 = vpop.f32.mrf.mxu1 }
 0x1b6   :  { %v1036_v21 = vpop.f32.mrf.mxu3  ;;  %v1085_v17 = vpop.f32.mrf.mxu0 }
 0x1b7   :  { %v1086_v24 = vadd.f32 %v1085_v17, %v2392_v22 }
 0x1b8   :  { %v1136_v23 = vpop.f32.mrf.mxu1 }
 0x1b9   :  { %v1135_v29 = vadd.f32 %v1134_v19, %v1086_v24 }
 0x1bb   :  { %v1175_v34 = vmax.f32 %v1135_v29, 0.0 }
 0x1bc   :  { %v987_v25 = vpop.f32.mrf.mxu2 }
 0x1bd   :  { %v988_v32 = vadd.f32 %v987_v25, %v2395_v26 }
 0x1be   :  { %v1038_v27 = vpop.f32.mrf.mxu3  ;;  %v1087_v28 = vpop.f32.mrf.mxu0 }
 0x1bf   :  { %v1088_v30 = vadd.f32 %v1087_v28, %v2392_v22  ;;  %v1037_v37 = vadd.f32 %v1036_v21, %v988_v32 }
 0x1c0   :  { %v1139_v31 = vpop.f32.mrf.mxu1 }
 0x1c1   :  { %v1137_v33 = vadd.f32 %v1136_v23, %v1088_v30  ;;  %v1174_v44 = vmax.f32 %v1037_v37, 0.0 }
 0x1c3   :  { %v1177_v35 = vmax.f32 %v1137_v33, 0.0 }
 0x1c4   :  { %v989_v36 = vpop.f32.mrf.mxu2 }
 0x1c5   :  { %v1207_v38 = vpack.c.bf16 %v1177_v35, %v1175_v34  ;;  %v990_v39 = vadd.f32 %v989_v36, %v2395_v26 }
 0x1c6   :  { %v1041_v40 = vpop.f32.mrf.mxu3  ;;  %v1090_v41 = vpop.f32.mrf.mxu0 }
 0x1c7   :  { %v1039_v42 = vadd.f32 %v1038_v27, %v990_v39  ;;  %1411 = vmatmul.bf16.vlgmr.msra.gmra.mxu3 %v1207_v38  ;;  %v1091_v47 = vadd.f32 %v1090_v41, %v2392_v22 }
 0x1c8   :  { %v1141_v43 = vpop.f32.mrf.mxu1 }
 0x1c9   :  { %v1176_v45 = vmax.f32 %v1039_v42, 0.0  ;;  %v1140_v51 = vadd.f32 %v1139_v31, %v1091_v47 }
 0x1cb   :  { %v1206_v46 = vpack.c.bf16 %v1176_v45, %v1174_v44  ;;  %v1179_v58 = vmax.f32 %v1140_v51, 0.0 }
 0x1cc   :  { %v992_v48 = vpop.f32.mrf.mxu2 }
 0x1cd   :  { %1362 = vmatmul.bf16.vlgmr.msra.gmra.mxu2 %v1206_v46  ;;  %v993_v54 = vadd.f32 %v992_v48, %v2395_v26 }
 0x1ce   :  { %v1043_v49 = vpop.f32.mrf.mxu3  ;;  %v1092_v50 = vpop.f32.mrf.mxu0 }
 0x1cf   :  { %v1093_v52 = vadd.f32 %v1092_v50, %v2392_v22  ;;  %v1042_v61 = vadd.f32 %v1041_v40, %v993_v54 }
 0x1d0   :  { %v1144_v53 = vpop.f32.mrf.mxu1 }
 0x1d1   :  { %v1142_v57 = vadd.f32 %v1141_v43, %v1093_v52  ;;  %v1178_v4 = vmax.f32 %v1042_v61, 0.0 }
 0x1d3   :  { %v1181_v59 = vmax.f32 %v1142_v57, 0.0 }
 0x1d4   :  { %v994_v60 = vpop.f32.mrf.mxu2 }
 0x1d5   :  { %v995_v62 = vadd.f32 %v994_v60, %v2395_v26  ;;  %v1209_v63 = vpack.c.bf16 %v1181_v59, %v1179_v58 }
 0x1d6   :  { %v1046_v0 = vpop.f32.mrf.mxu3  ;;  %v1095_v1 = vpop.f32.mrf.mxu0 }
 0x1d7   :  { %v1044_v2 = vadd.f32 %v1043_v49, %v995_v62  ;;  %1416 = vmatmul.bf16.gmra.mxu3 %v1209_v63  ;;  %v1096_v6 = vadd.f32 %v1095_v1, %v2392_v22 }
 0x1d8   :  { %v1146_v3 = vpop.f32.mrf.mxu1 }
 0x1d9   :  { %v1180_v5 = vmax.f32 %v1044_v2, 0.0  ;;  %v1145_v11 = vadd.f32 %v1144_v53, %v1096_v6 }
 0x1db   :  { %v1208_v7 = vpack.c.bf16 %v1180_v5, %v1178_v4  ;;  %v1183_v15 = vmax.f32 %v1145_v11, 0.0 }
 0x1dc   :  { %v997_v8 = vpop.f32.mrf.mxu2 }
 0x1dd   :  { %1367 = vmatmul.bf16.gmra.mxu2 %v1208_v7  ;;  %v998_v12 = vadd.f32 %v997_v8, %v2395_v26 }
 0x1de   :  { %v1048_v9 = vpop.f32.mrf.mxu3  ;;  %v1097_v10 = vpop.f32.mrf.mxu0 }
 0x1df   :  { %v1098_v55 = vadd.f32 %v1097_v10, %v2392_v22  ;;  %v1047_v18 = vadd.f32 %v1046_v0, %v998_v12 }
 0x1e0   :  { %v1149_v56 = vpop.f32.mrf.mxu1 }
 0x1e1   :  { %v1147_v14 = vadd.f32 %v1146_v3, %v1098_v55  ;;  %v1182_v25 = vmax.f32 %v1047_v18, 0.0 }
 0x1e3   :  { %v1185_v16 = vmax.f32 %v1147_v14, 0.0 }
 0x1e4   :  { %v999_v13 = vpop.f32.mrf.mxu2 }
 0x1e5   :  { %v1000_v19 = vadd.f32 %v999_v13, %v2395_v26  ;;  %v1211_v20 = vpack.c.bf16 %v1185_v16, %v1183_v15 }
 0x1e6   :  { %v1051_v21 = vpop.f32.mrf.mxu3  ;;  %v1100_v17 = vpop.f32.mrf.mxu0 }
 0x1e7   :  { %v1049_v23 = vadd.f32 %v1048_v9, %v1000_v19  ;;  %1421 = vmatmul.bf16.gmra.mxu3 %v1211_v20  ;;  %v1101_v28 = vadd.f32 %v1100_v17, %v2392_v22 }
 0x1e8   :  { %v1151_v24 = vpop.f32.mrf.mxu1 }
 0x1e9   :  { %v1184_v27 = vmax.f32 %v1049_v23, 0.0  ;;  %v1150_v33 = vadd.f32 %v1149_v56, %v1101_v28 }
 0x1eb   :  { %v1210_v29 = vpack.c.bf16 %v1184_v27, %v1182_v25  ;;  %v1187_v38 = vmax.f32 %v1150_v33, 0.0 }
 0x1ec   :  { %v1002_v30 = vpop.f32.mrf.mxu2 }
 0x1ed   :  { %1372 = vmatmul.bf16.gmra.mxu2 %v1210_v29  ;;  %v1003_v36 = vadd.f32 %v1002_v30, %v2395_v26 }
 0x1ee   :  { %v1053_v31 = vpop.f32.mrf.mxu3  ;;  %v1102_v32 = vpop.f32.mrf.mxu0 }
 0x1ef   :  { %v1103_v34 = vadd.f32 %v1102_v32, %v2392_v22  ;;  %v1052_v41 = vadd.f32 %v1051_v21, %v1003_v36 }
 0x1f0   :  { %v1154_v35 = vpop.f32.mrf.mxu1 }
 0x1f1   :  { %v1152_v37 = vadd.f32 %v1151_v24, %v1103_v34  ;;  %v1186_v48 = vmax.f32 %v1052_v41, 0.0 }
 0x1f3   :  { %v1189_v39 = vmax.f32 %v1152_v37, 0.0 }
 0x1f4   :  { %v1004_v40 = vpop.f32.mrf.mxu2 }
 0x1f5   :  { %v1005_v42 = vadd.f32 %v1004_v40, %v2395_v26  ;;  %v1213_v43 = vpack.c.bf16 %v1189_v39, %v1187_v38 }
 0x1f6   :  { %v1056_v44 = vpop.f32.mrf.mxu3  ;;  %v1105_v45 = vpop.f32.mrf.mxu0 }
 0x1f7   :  { %v1054_v46 = vadd.f32 %v1053_v31, %v1005_v42  ;;  %1426 = vmatmul.bf16.gmra.mxu3 %v1213_v43  ;;  %v1106_v50 = vadd.f32 %v1105_v45, %v2392_v22 }
 0x1f8   :  { %v1156_v47 = vpop.f32.mrf.mxu1 }
 0x1f9   :  { %v1188_v49 = vmax.f32 %v1054_v46, 0.0  ;;  %v1155_v57 = vadd.f32 %v1154_v35, %v1106_v50 }
 0x1fb   :  { %v1212_v51 = vpack.c.bf16 %v1188_v49, %v1186_v48  ;;  %v1191_v62 = vmax.f32 %v1155_v57, 0.0 }
 0x1fc   :  { %v1007_v52 = vpop.f32.mrf.mxu2 }
 0x1fd   :  { %1377 = vmatmul.bf16.gmra.mxu2 %v1212_v51  ;;  %v1008_v60 = vadd.f32 %v1007_v52, %v2395_v26 }
 0x1fe   :  { %v1058_v53 = vpop.f32.mrf.mxu3  ;;  %v1107_v54 = vpop.f32.mrf.mxu0 }
 0x1ff   :  { %v1108_v58 = vadd.f32 %v1107_v54, %v2392_v22  ;;  %v1057_v1 = vadd.f32 %v1056_v44, %v1008_v60 }
 0x200   :  { %v1159_v59 = vpop.f32.mrf.mxu1 }
 0x201   :  { %v1157_v61 = vadd.f32 %v1156_v47, %v1108_v58  ;;  %v1190_v8 = vmax.f32 %v1057_v1, 0.0 }
 0x203   :  { %v1193_v63 = vmax.f32 %v1157_v61, 0.0 }
 0x204   :  { %v1009_v0 = vpop.f32.mrf.mxu2 }
 0x205   :  { %v1010_v2 = vadd.f32 %v1009_v0, %v2395_v26  ;;  %v1215_v3 = vpack.c.bf16 %v1193_v63, %v1191_v62 }
 0x206   :  { %v1061_v4 = vpop.f32.mrf.mxu3  ;;  %v1110_v5 = vpop.f32.mrf.mxu0 }
 0x207   :  { %v1059_v6 = vadd.f32 %v1058_v53, %v1010_v2  ;;  %1431 = vmatmul.bf16.gmra.mxu3 %v1215_v3  ;;  %v1111_v10 = vadd.f32 %v1110_v5, %v2392_v22 }
 0x208   :  { %v1161_v7 = vpop.f32.mrf.mxu1 }
 0x209   :  { %v1192_v9 = vmax.f32 %v1059_v6, 0.0  ;;  %v1160_v14 = vadd.f32 %v1159_v59, %v1111_v10 }
 0x20b   :  { %v1214_v11 = vpack.c.bf16 %v1192_v9, %v1190_v8  ;;  %v1195_v19 = vmax.f32 %v1160_v14, 0.0 }
 0x20c   :  { %v1012_v55 = vpop.f32.mrf.mxu2 }
 0x20d   :  { %1382 = vmatmul.bf16.gmra.mxu2 %v1214_v11  ;;  %v1013_v16 = vadd.f32 %v1012_v55, %v2395_v26 }
 0x20e   :  { %v1063_v56 = vpop.f32.mrf.mxu3  ;;  %v1112_v12 = vpop.f32.mrf.mxu0 }
 0x20f   :  { %v1113_v15 = vadd.f32 %v1112_v12, %v2392_v22  ;;  %v1062_v17 = vadd.f32 %v1061_v4, %v1013_v16 }
 0x210   :  { %v1164_v18 = vpop.f32.mrf.mxu1 }
 0x211   :  { %v1162_v13 = vadd.f32 %v1161_v7, %v1113_v15  ;;  %v1194_v29 = vmax.f32 %v1062_v17, 0.0 }
 0x213   :  { %v1197_v20 = vmax.f32 %v1162_v13, 0.0 }
 0x214   :  { %v1014_v21 = vpop.f32.mrf.mxu2 }
 0x215   :  { %v1015_v23 = vadd.f32 %v1014_v21, %v2395_v26  ;;  %v1217_v24 = vpack.c.bf16 %v1197_v20, %v1195_v19 }
 0x216   :  { %v1115_v25 = vpop.f32.mrf.mxu0  ;;  %v1066_v28 = vpop.f32.mrf.mxu3 }
 0x217   :  { %v1064_v27 = vadd.f32 %v1063_v56, %v1015_v23  ;;  %1436 = vmatmul.bf16.gmra.mxu3 %v1217_v24  ;;  %v1116_v31 = vadd.f32 %v1115_v25, %v2392_v22 }
 0x218   :  { %v1166_v33 = vpop.f32.mrf.mxu1 }
 0x219   :  { %v1196_v30 = vmax.f32 %v1064_v27, 0.0  ;;  %v1165_v36 = vadd.f32 %v1164_v18, %v1116_v31 }
 0x21b   :  { %v1216_v32 = vpack.c.bf16 %v1196_v30, %v1194_v29  ;;  %v1199_v41 = vmax.f32 %v1165_v36, 0.0 }
 0x21c   :  { %v1017_v34 = vpop.f32.mrf.mxu2 }
 0x21d   :  { %1387 = vmatmul.bf16.gmra.mxu2 %v1216_v32  ;;  %v1018_v38 = vadd.f32 %v1017_v34, %v2395_v26 }
 0x21e   :  { %v1117_v35 = vpop.f32.mrf.mxu0  ;;  %v1068_v40 = vpop.f32.mrf.mxu3 }
 0x21f   :  { %v1118_v37 = vadd.f32 %v1117_v35, %v2392_v22  ;;  %v1067_v44 = vadd.f32 %v1066_v28, %v1018_v38 }
 0x220   :  { %v1169_v47 = vpop.f32.mrf.mxu1 }
 0x221   :  { %v1167_v39 = vadd.f32 %v1166_v33, %v1118_v37  ;;  %v1198_v50 = vmax.f32 %v1067_v44, 0.0 }
 0x223   :  { %v1201_v42 = vmax.f32 %v1167_v39, 0.0 }
 0x224   :  { %v1019_v43 = vpop.f32.mrf.mxu2 }
 0x225   :  { %v1020_v45 = vadd.f32 %v1019_v43, %v2395_v26  ;;  %v1219_v46 = vpack.c.bf16 %v1201_v42, %v1199_v41 }
 0x226   :  { %v1120_v48 = vpop.f32.mrf.mxu0  ;;  %v1071_v54 = vpop.f32.mrf.mxu3 }
 0x227   :  { %v1069_v49 = vadd.f32 %v1068_v40, %v1020_v45  ;;  %1441 = vmatmul.bf16.gmra.mxu3 %v1219_v46  ;;  %v1121_v52 = vadd.f32 %v1120_v48, %v2392_v22 }
 0x228   :  { %v1171_v61 = vpop.f32.mrf.mxu1 }
 0x229   :  { %v1200_v51 = vmax.f32 %v1069_v49, 0.0  ;;  %v1170_v59 = vadd.f32 %v1169_v47, %v1121_v52 }
 0x22b   :  { %v1218_v53 = vpack.c.bf16 %v1200_v51, %v1198_v50  ;;  %v1203_v0 = vmax.f32 %v1170_v59, 0.0 }
 0x22c   :  { %v1022_v57 = vpop.f32.mrf.mxu2 }
 0x22d   :  { %1392 = vmatmul.bf16.gmra.mxu2 %v1218_v53  ;;  %v1023_v62 = vadd.f32 %v1022_v57, %v2395_v26 }
 0x22e   :  { %v1122_v58 = vpop.f32.mrf.mxu0  ;;  %v1073_v6 = vpop.f32.mrf.mxu3 }
 0x22f   :  { %v1123_v60 = vadd.f32 %v1122_v58, %v2392_v22  ;;  %v1072_v3 = vadd.f32 %v1071_v54, %v1023_v62  ;;  %v2431_v22 = vld [vmem:[%s2498_s8] ss:$0 sm:$0xff]  ;;  %s2181_s8 = smov [#allocation8]  }
 0x230   :  { %s1539_s19 = sshll.u32 %s2181_s8, 4  ;;  %s1540_s19 = int_to_ptr.vmem [resolvable:$true] %s1539_s19 }
 0x231   :  { %v1172_v63 = vadd.f32 %v1171_v61, %v1123_v60  ;;  %v1202_v8 = vmax.f32 %v1072_v3, 0.0 }
 0x233   :  { %v1205_v1 = vmax.f32 %v1172_v63, 0.0 }
 0x234   :  { %v1024_v2 = vpop.f32.mrf.mxu2 }
 0x235   :  { %v1025_v4 = vadd.f32 %v1024_v2, %v2395_v26  ;;  %v1221_v5 = vpack.c.bf16 %v1205_v1, %v1203_v0  ;;  %v1500_v26 = vlaneseq }
 0x237   :  { %v1074_v7 = vadd.f32 %v1073_v6, %v1025_v4  ;;  %1446 = vmatmul.bf16.gmra.mxu3 %v1221_v5  ;;  %v2434_v16 = vand.u32 127, %v1500_v26 }
 0x239   :  { %v1204_v9 = vmax.f32 %v1074_v7, 0.0  ;;  %vm1502_vm1 = vcmp.ge.s32.totalorder %v2434_v16, 64 }
 0x23b   :  { %v1220_v10 = vpack.c.bf16 %v1204_v9, %v1202_v8 }
 0x23d   :  { %1397 = vmatmul.bf16.gmra.mxu2 %v1220_v10 }
 0x24a   :  { %v1412_v11 = vpop.f32.mrf.mxu3 }
 0x250   :  { %v1363_v55 = vpop.f32.mrf.mxu2 }
 0x251   :  { %v1364_v56 = vadd.f32 %v2431_v22, %v1363_v55 }
 0x252   :  { %v1414_v12 = vpop.f32.mrf.mxu3 }
 0x253   :  { %v1413_v14 = vadd.f32 %v1412_v11, %v1364_v56 }
 0x255   :  { %2040 = vtanh.f32 %v1413_v14 }
 0x258   :  { %v1365_v15 = vpop.f32.mrf.mxu2 }
 0x259   :  { %v1366_v13 = vadd.f32 %v2431_v22, %v1365_v15 }
 0x25a   :  { %v1417_v18 = vpop.f32.mrf.mxu3 }
 0x25b   :  { %v2041_v19 = vpop.eup %2040  ;;  %v1415_v20 = vadd.f32 %v1414_v12, %v1366_v13 }
 0x25c   :  { %v1468_v21 = vmul.f32 3.5, %v2041_v19 }
 0x25d   :  { %2042 = vtanh.f32 %v1415_v20 }
 0x25e   :  { %v1484_v17 = vadd.f32 -1.5, %v1468_v21 }
 0x260   :  { %v1503_v23 = vsel %vm1502_vm1, %v1484_v17, %v1413_v14  ;;  %v1368_v24 = vpop.f32.mrf.mxu2 }
 0x261   :  { %1519 = vst [vmem:[#allocation8] sm:$0xff] %v1503_v23  ;;  %v1369_v25 = vadd.f32 %v2431_v22, %v1368_v24 }
 0x262   :  { %v1419_v27 = vpop.f32.mrf.mxu3 }
 0x263   :  { %v2043_v28 = vpop.eup %2042  ;;  %v1418_v29 = vadd.f32 %v1417_v18, %v1369_v25 }
 0x264   :  { %v1469_v30 = vmul.f32 3.5, %v2043_v28 }
 0x265   :  { %2044 = vtanh.f32 %v1418_v29 }
 0x266   :  { %v1485_v31 = vadd.f32 -1.5, %v1469_v30 }
 0x268   :  { %v1504_v32 = vsel %vm1502_vm1, %v1485_v31, %v1415_v20  ;;  %v1370_v33 = vpop.f32.mrf.mxu2 }
 0x269   :  { %1520 = vst [vmem:[#allocation8 + $0x8] sm:$0xff] %v1504_v32  ;;  %v1371_v34 = vadd.f32 %v2431_v22, %v1370_v33 }
 0x26a   :  { %v1422_v35 = vpop.f32.mrf.mxu3 }
 0x26b   :  { %v2045_v36 = vpop.eup %2044  ;;  %v1420_v37 = vadd.f32 %v1419_v27, %v1371_v34 }
 0x26c   :  { %v1470_v38 = vmul.f32 3.5, %v2045_v36 }
 0x26d   :  { %2046 = vtanh.f32 %v1420_v37 }
 0x26e   :  { %v1486_v39 = vadd.f32 -1.5, %v1470_v38 }
 0x270   :  { %v1505_v40 = vsel %vm1502_vm1, %v1486_v39, %v1418_v29  ;;  %v1373_v41 = vpop.f32.mrf.mxu2 }
 0x271   :  { %1521 = vst [vmem:[#allocation8 + $0x10] sm:$0xff] %v1505_v40  ;;  %v1374_v42 = vadd.f32 %v2431_v22, %v1373_v41 }
 0x272   :  { %v1424_v43 = vpop.f32.mrf.mxu3 }
 0x273   :  { %v2047_v44 = vpop.eup %2046  ;;  %v1423_v45 = vadd.f32 %v1422_v35, %v1374_v42 }
 0x274   :  { %v1471_v46 = vmul.f32 3.5, %v2047_v44 }
 0x275   :  { %2048 = vtanh.f32 %v1423_v45 }
 0x276   :  { %v1487_v47 = vadd.f32 -1.5, %v1471_v46 }
 0x278   :  { %v1506_v48 = vsel %vm1502_vm1, %v1487_v47, %v1420_v37  ;;  %v1375_v49 = vpop.f32.mrf.mxu2 }
 0x279   :  { %1522 = vst [vmem:[#allocation8 + $0x18] sm:$0xff] %v1506_v48  ;;  %v1376_v50 = vadd.f32 %v2431_v22, %v1375_v49 }
 0x27a   :  { %v1427_v51 = vpop.f32.mrf.mxu3 }
 0x27b   :  { %v2049_v52 = vpop.eup %2048  ;;  %v1425_v53 = vadd.f32 %v1424_v43, %v1376_v50 }
 0x27c   :  { %v1472_v54 = vmul.f32 3.5, %v2049_v52 }
 0x27d   :  { %2050 = vtanh.f32 %v1425_v53 }
 0x27e   :  { %v1488_v57 = vadd.f32 -1.5, %v1472_v54 }
 0x280   :  { %v1507_v58 = vsel %vm1502_vm1, %v1488_v57, %v1423_v45  ;;  %v1378_v59 = vpop.f32.mrf.mxu2 }
 0x281   :  { %1523 = vst [vmem:[#allocation8 + $0x20] sm:$0xff] %v1507_v58  ;;  %v1379_v60 = vadd.f32 %v2431_v22, %v1378_v59 }
 0x282   :  { %v1429_v61 = vpop.f32.mrf.mxu3 }
 0x283   :  { %v2051_v62 = vpop.eup %2050  ;;  %v1428_v63 = vadd.f32 %v1427_v51, %v1379_v60 }
 0x284   :  { %v1473_v0 = vmul.f32 3.5, %v2051_v62 }
 0x285   :  { %2052 = vtanh.f32 %v1428_v63 }
 0x286   :  { %v1489_v1 = vadd.f32 -1.5, %v1473_v0 }
 0x288   :  { %v1508_v2 = vsel %vm1502_vm1, %v1489_v1, %v1425_v53  ;;  %v1380_v3 = vpop.f32.mrf.mxu2 }
 0x289   :  { %1524 = vst [vmem:[#allocation8 + $0x28] sm:$0xff] %v1508_v2  ;;  %v1381_v4 = vadd.f32 %v2431_v22, %v1380_v3 }
 0x28a   :  { %v1432_v5 = vpop.f32.mrf.mxu3 }
 0x28b   :  { %v2053_v6 = vpop.eup %2052  ;;  %v1430_v7 = vadd.f32 %v1429_v61, %v1381_v4 }
 0x28c   :  { %v1474_v8 = vmul.f32 3.5, %v2053_v6 }
 0x28d   :  { %2054 = vtanh.f32 %v1430_v7 }
 0x28e   :  { %v1490_v9 = vadd.f32 -1.5, %v1474_v8 }
 0x290   :  { %v1509_v10 = vsel %vm1502_vm1, %v1490_v9, %v1428_v63  ;;  %v1383_v11 = vpop.f32.mrf.mxu2 }
 0x291   :  { %1525 = vst [vmem:[#allocation8 + $0x30] sm:$0xff] %v1509_v10  ;;  %v1384_v55 = vadd.f32 %v2431_v22, %v1383_v11 }
 0x292   :  { %v1434_v56 = vpop.f32.mrf.mxu3 }
 0x293   :  { %v2055_v12 = vpop.eup %2054  ;;  %v1433_v14 = vadd.f32 %v1432_v5, %v1384_v55 }
 0x294   :  { %v1475_v26 = vmul.f32 3.5, %v2055_v12 }
 0x295   :  { %2056 = vtanh.f32 %v1433_v14 }
 0x296   :  { %v1491_v15 = vadd.f32 -1.5, %v1475_v26 }
 0x298   :  { %v1510_v13 = vsel %vm1502_vm1, %v1491_v15, %v1430_v7  ;;  %v1385_v18 = vpop.f32.mrf.mxu2 }
 0x299   :  { %1526 = vst [vmem:[#allocation8 + $0x38] sm:$0xff] %v1510_v13  ;;  %v1386_v19 = vadd.f32 %v2431_v22, %v1385_v18 }
 0x29a   :  { %v1437_v20 = vpop.f32.mrf.mxu3 }
 0x29b   :  { %v2057_v21 = vpop.eup %2056  ;;  %v1435_v17 = vadd.f32 %v1434_v56, %v1386_v19 }
 0x29c   :  { %v1476_v23 = vmul.f32 3.5, %v2057_v21 }
 0x29d   :  { %2058 = vtanh.f32 %v1435_v17 }
 0x29e   :  { %v1492_v24 = vadd.f32 -1.5, %v1476_v23 }
 0x2a0   :  { %v1511_v25 = vsel %vm1502_vm1, %v1492_v24, %v1433_v14  ;;  %v1388_v27 = vpop.f32.mrf.mxu2 }
 0x2a1   :  { %1527 = vst [vmem:[#allocation8 + $0x40] sm:$0xff] %v1511_v25  ;;  %v1389_v28 = vadd.f32 %v2431_v22, %v1388_v27 }
 0x2a2   :  { %v1439_v29 = vpop.f32.mrf.mxu3 }
 0x2a3   :  { %v2059_v30 = vpop.eup %2058  ;;  %v1438_v31 = vadd.f32 %v1437_v20, %v1389_v28 }
 0x2a4   :  { %v1477_v32 = vmul.f32 3.5, %v2059_v30 }
 0x2a5   :  { %2060 = vtanh.f32 %v1438_v31 }
 0x2a6   :  { %v1493_v33 = vadd.f32 -1.5, %v1477_v32 }
 0x2a8   :  { %v1512_v34 = vsel %vm1502_vm1, %v1493_v33, %v1435_v17  ;;  %v1390_v35 = vpop.f32.mrf.mxu2 }
 0x2a9   :  { %1528 = vst [vmem:[#allocation8 + $0x48] sm:$0xff] %v1512_v34  ;;  %v1391_v36 = vadd.f32 %v2431_v22, %v1390_v35 }
 0x2aa   :  { %v1442_v40 = vpop.f32.mrf.mxu3 }
 0x2ab   :  { %v2061_v37 = vpop.eup %2060  ;;  %v1440_v38 = vadd.f32 %v1439_v29, %v1391_v36 }
 0x2ac   :  { %v1478_v39 = vmul.f32 3.5, %v2061_v37 }
 0x2ad   :  { %2062 = vtanh.f32 %v1440_v38 }
 0x2ae   :  { %v1494_v41 = vadd.f32 -1.5, %v1478_v39 }
 0x2b0   :  { %v1513_v42 = vsel %vm1502_vm1, %v1494_v41, %v1438_v31  ;;  %v1393_v43 = vpop.f32.mrf.mxu2 }
 0x2b1   :  { %1529 = vst [vmem:[#allocation8 + $0x50] sm:$0xff] %v1513_v42  ;;  %v1394_v44 = vadd.f32 %v2431_v22, %v1393_v43 }
 0x2b2   :  { %v1444_v49 = vpop.f32.mrf.mxu3 }
 0x2b3   :  { %v2063_v45 = vpop.eup %2062  ;;  %v1443_v46 = vadd.f32 %v1442_v40, %v1394_v44 }
 0x2b4   :  { %v1479_v47 = vmul.f32 3.5, %v2063_v45 }
 0x2b5   :  { %2064 = vtanh.f32 %v1443_v46 }
 0x2b6   :  { %v1495_v48 = vadd.f32 -1.5, %v1479_v47 }
 0x2b8   :  { %v1514_v50 = vsel %vm1502_vm1, %v1495_v48, %v1440_v38  ;;  %v1395_v51 = vpop.f32.mrf.mxu2 }
 0x2b9   :  { %1530 = vst [vmem:[#allocation8 + $0x58] sm:$0xff] %v1514_v50  ;;  %v1396_v52 = vadd.f32 %v2431_v22, %v1395_v51 }
 0x2ba   :  { %v1447_v60 = vpop.f32.mrf.mxu3 }
 0x2bb   :  { %v2065_v53 = vpop.eup %2064  ;;  %v1445_v54 = vadd.f32 %v1444_v49, %v1396_v52 }
 0x2bc   :  { %v1480_v57 = vmul.f32 3.5, %v2065_v53 }
 0x2bd   :  { %2066 = vtanh.f32 %v1445_v54 }
 0x2be   :  { %v1496_v58 = vadd.f32 -1.5, %v1480_v57 }
 0x2c0   :  { %v1515_v59 = vsel %vm1502_vm1, %v1496_v58, %v1443_v46  ;;  %v1398_v61 = vpop.f32.mrf.mxu2 }
 0x2c1   :  { %1531 = vst [vmem:[#allocation8 + $0x60] sm:$0xff] %v1515_v59  ;;  %v1399_v62 = vadd.f32 %v2431_v22, %v1398_v61 }
 0x2c2   :  { %v1449_v6 = vpop.f32.mrf.mxu3 }
 0x2c3   :  { %v2067_v63 = vpop.eup %2066  ;;  %v1448_v0 = vadd.f32 %v1447_v60, %v1399_v62 }
 0x2c4   :  { %v1481_v1 = vmul.f32 3.5, %v2067_v63 }
 0x2c5   :  { %2068 = vtanh.f32 %v1448_v0 }
 0x2c6   :  { %v1497_v2 = vadd.f32 -1.5, %v1481_v1 }
 0x2c8   :  { %v1516_v3 = vsel %vm1502_vm1, %v1497_v2, %v1445_v54  ;;  %v1400_v4 = vpop.f32.mrf.mxu2 }
 0x2c9   :  { %1532 = vst [vmem:[#allocation8 + $0x68] sm:$0xff] %v1516_v3  ;;  %v1401_v5 = vadd.f32 %v2431_v22, %v1400_v4 }
 0x2cb   :  { %v2069_v7 = vpop.eup %2068  ;;  %v1450_v8 = vadd.f32 %v1449_v6, %v1401_v5 }
 0x2cc   :  { %v1482_v9 = vmul.f32 3.5, %v2069_v7 }
 0x2cd   :  { %2070 = vtanh.f32 %v1450_v8 }
 0x2ce   :  { %v1498_v10 = vadd.f32 -1.5, %v1482_v9 }
 0x2d0   :  { %v1517_v11 = vsel %vm1502_vm1, %v1498_v10, %v1448_v0 }
 0x2d1   :  { %1533 = vst [vmem:[#allocation8 + $0x70] sm:$0xff] %v1517_v11 }
 0x2d3   :  { %v2071_v55 = vpop.eup %2070 }
 0x2d4   :  { %v1483_v56 = vmul.f32 3.5, %v2071_v55 }
 0x2d6   :  { %v1499_v12 = vadd.f32 -1.5, %v1483_v56 }
 0x2d8   :  { %v1518_v22 = vsel %vm1502_vm1, %v1499_v12, %v1450_v8 }
 0x2d9   :  { %1534 = vst [vmem:[#allocation8 + $0x78] sm:$0xff] %v1518_v22 }
 0x2da   :  { %1547 = dma.vmem_to_hbm [thread:$0]  %s1540_s19, 2048, %s1542_s22, [#allocation4], %s2175_s17, %s2175_s17, %s2176_s18  }
 0x2db   :  { %2172 = dma.done.wait [#allocation4], 2048  }
 0x2dc   :  { %2173 = vsyncadd [#allocation4], 4294965248 }
 0x2dd   :  { %1552 = vsyncpa [#allocation3], 1 }
 0x2de   :  { %1553 = vsyncpa [#allocation6], 1 }
 0x2df   :  { %1554 = vsyncpa [#allocation4], 1 }

</bundles_post_ra>
